<compile_context>
chip_gen: v6e
topology: v6e:2x2x1
jax: 0.10.0
libtpu: 0.0.40
codegen_flags: <defaults>
</compile_context>

<pallas_src>
import functools
import math

import jax
import jax.numpy as jnp
import numpy as np
from jax.experimental import pallas as pl
from jax.experimental.pallas import tpu as pltpu


def _autocorr_kernel(xq_ref, xk_ref, xv_ref,
                     wq_ref, wk_ref, wv_ref,
                     bq_ref, bk_ref, bv_ref,
                     cos_ref, sin_ref,
                     out_ref, *, L, dk, topk, bt):
    D = wq_ref.shape[1]

    # ---- Q/K/V projections on the MXU over the whole (bt*L, D) tile ----
    xq = xq_ref[...].reshape(bt * L, D)
    xk = xk_ref[...].reshape(bt * L, D)
    xv = xv_ref[...].reshape(bt * L, D)
    q_full = jnp.dot(xq, wq_ref[...], preferred_element_type=jnp.float32) + bq_ref[...]
    k_full = jnp.dot(xk, wk_ref[...], preferred_element_type=jnp.float32) + bk_ref[...]
    v_full = jnp.dot(xv, wv_ref[...], preferred_element_type=jnp.float32) + bv_ref[...]

    C = cos_ref[...]                                               # (L, L) DFT cos
    S = sin_ref[...]                                               # (L, L) DFT sin

    tau_iota = jax.lax.broadcasted_iota(jnp.int32, (L, D), 0)      # time index
    col_off = jax.lax.broadcasted_iota(jnp.int32, (1, D), 1) % dk  # within-head offset
    inv_L = 1.0 / float(L)

    for b in range(bt):                      # small static batch block
        q = q_full[b * L:(b + 1) * L, :]     # (L, D) — all heads side by side on lanes
        k = k_full[b * L:(b + 1) * L, :]
        v = v_full[b * L:(b + 1) * L, :]

        # Circular cross-correlation along time via full real-DFT matmuls (MXU):
        #   corr[tau, d] = sum_t q[t, d] * k[(t - tau) mod L, d]
        #               == irfft(rfft(q) * conj(rfft(k)))  for even L.
        qr = jnp.dot(C, q, preferred_element_type=jnp.float32)
        qi = jnp.dot(S, q, preferred_element_type=jnp.float32)
        kr = jnp.dot(C, k, preferred_element_type=jnp.float32)
        ki = jnp.dot(S, k, preferred_element_type=jnp.float32)
        pr = qr * kr + qi * ki               # Re(Qf * conj(Kf))
        pi = qr * ki - qi * kr               # Im(Qf * conj(Kf))
        corr = (jnp.dot(C, pr, preferred_element_type=jnp.float32)
                - jnp.dot(S, pi, preferred_element_type=jnp.float32)) * inv_L  # (L, D)

        # Top-k over tau per feature column, with fused softmax + weighted
        # gather mask (single reduction at the end instead of topk of them).
        m0 = jnp.max(corr, axis=0, keepdims=True)        # top-1 == softmax max
        work = corr
        wmask = jnp.zeros((L, D), jnp.float32)
        denom = jnp.zeros((1, D), jnp.float32)
        for i in range(topk):                            # topk = int(c*log L): small
            m = jnp.max(work, axis=0, keepdims=True)                         # (1, D)
            idx = jnp.min(jnp.where(work == m, tau_iota, L), axis=0, keepdims=True)
            e = jnp.exp(m - m0)                                              # (1, D)
            denom = denom + e
            gidx = jnp.minimum(idx + col_off, L - 1)     # clamp(I_topk + d, L-1)
            wmask = wmask + jnp.where(tau_iota == gidx, e, 0.0)
            work = jnp.where(tau_iota == idx, -jnp.inf, work)

        # row[d] = L * sum_i softmax_w[i,d] * v[clamp(I_topk[i,d]+d, L-1), d]
        gathered = jnp.sum(wmask * v, axis=0, keepdims=True)                 # (1, D)
        row = gathered / denom * float(L)
        out_ref[b:b + 1, :] = row            # lane-dense (1, D) store


def auto_correlation(xq, xk, xv, params, *, h, c, bt=None):
    """Pallas implementation of AutoCorrelation.forward."""
    B, L, D = xq.shape
    dk = D // h
    assert dk == L, "reference module's broadcasting requires d_model // h == L"
    assert L % 2 == 0, "irfft default length matches rfft input only for even L"
    topk = int(c * math.log(L))
    assert 1 <= topk <= L

    if bt is None:                       # batch rows per grid step (bigger MXU M)
        bt = 2 if (B % 2 == 0 and B >= 2) else 1
    assert B % bt == 0

    wq, bq, wk, bk, wv, bv = params
    bq2, bk2, bv2 = (jnp.asarray(x).reshape(1, D) for x in (bq, bk, bv))

    # L x L real-DFT matrices (host-side) so the correlation runs on the MXU.
    t = np.arange(L, dtype=np.float64)
    ang = (2.0 * np.pi / L) * np.outer(t, t)
    cos_m = jnp.asarray(np.cos(ang), dtype=jnp.float32)
    sin_m = jnp.asarray(np.sin(ang), dtype=jnp.float32)

    kernel = functools.partial(_autocorr_kernel, L=L, dk=dk, topk=topk, bt=bt)

    x_spec = pl.BlockSpec((bt, L, D), lambda i: (i, 0, 0))
    w_spec = pl.BlockSpec((D, D), lambda i: (0, 0))
    b_spec = pl.BlockSpec((1, D), lambda i: (0, 0))
    f_spec = pl.BlockSpec((L, L), lambda i: (0, 0))

    r_sum = pl.pallas_call(
        kernel,
        out_shape=jax.ShapeDtypeStruct((B, D), jnp.float32),
        grid_spec=pltpu.PrefetchScalarGridSpec(
            num_scalar_prefetch=0,
            grid=(B // bt,),
            in_specs=[x_spec, x_spec, x_spec,
                      w_spec, w_spec, w_spec,
                      b_spec, b_spec, b_spec,
                      f_spec, f_spec],
            out_specs=pl.BlockSpec((bt, D), lambda i: (i, 0)),
        ),
        compiler_params=pltpu.CompilerParams(
            dimension_semantics=("parallel",),
            vmem_limit_bytes=32 * 1024 * 1024,
        ),
    )(xq, xk, xv, wq, wk, wv, bq2, bk2, bv2, cos_m, sin_m)

    # TODO(synk): the reference applies .permute(0, 2, 1, 3) to the 3-D tensor
    # R.sum(dim=2), which is invalid PyTorch; we reproduce R.sum(dim=2) exactly
    # (flattened over (h, dk) into D lanes) and apply the final .view(B, L, -1).
    return r_sum.reshape(B, L, -1)


def _reference(xq, xk, xv, params, *, h, c):
    """Pure-JAX mirror of the (fixed-up) forward pass, for validation."""
    B, L, D = xq.shape
    dk = D // h
    topk = int(c * math.log(L))
    wq, bq, wk, bk, wv, bv = params
    q = (xq @ wq + bq).reshape(B, L, h, dk).transpose(0, 2, 1, 3)
    k = (xk @ wk + bk).reshape(B, L, h, dk).transpose(0, 2, 1, 3)
    v = (xv @ wv + bv).reshape(B, L, h, dk).transpose(0, 2, 1, 3)
    corr = jnp.stack(
        [jnp.sum(q * jnp.roll(k, tau, axis=2), axis=2) for tau in range(L)], axis=2)
    wt, it = jax.lax.top_k(jnp.swapaxes(corr, 2, 3), topk)        # (B, h, dk, topk)
    wt = jax.nn.softmax(wt, axis=-1)
    gidx = jnp.minimum(it + jnp.arange(dk)[None, None, :, None], L - 1)
    vt = jnp.swapaxes(v, 2, 3)                                    # (B, h, dk, L)
    gathered = jnp.take_along_axis(vt, gidx, axis=-1)
    row = jnp.sum(wt * gathered, axis=-1)                         # (B, h, dk)
    return (float(L) * row).reshape(B, L, -1)


if __name__ == "__main__":
    B, L, h, c = 2, 8, 4, 2
    dk = L
    D = h * dk            # d_model = 32 (d_model // h == L required by reference)

    key = jax.random.PRNGKey(0)
    ks = jax.random.split(key, 9)
    bound = 1.0 / math.sqrt(D)

    def make_linear(kw, kb):
        w = jax.random.uniform(kw, (D, D), jnp.float32, -bound, bound)
        b = jax.random.uniform(kb, (D,), jnp.float32, -bound, bound)
        return w, b

    wq, bq = make_linear(ks[0], ks[1])
    wk, bk = make_linear(ks[2], ks[3])
    wv, bv = make_linear(ks[4], ks[5])
    params = (wq, bq, wk, bk, wv, bv)

    Q = jax.random.normal(ks[6], (B, L, D), jnp.float32)
    K = jax.random.normal(ks[7], (B, L, D), jnp.float32)
    V = jax.random.normal(ks[8], (B, L, D), jnp.float32)

    out = auto_correlation(Q, K, V, params, h=h, c=c)
    out = jax.block_until_ready(out)

    ref = jax.block_until_ready(_reference(Q, K, V, params, h=h, c=c))
    np.testing.assert_allclose(np.asarray(out), np.asarray(ref), rtol=1e-4, atol=1e-4)

    print("KERNEL_OK")
</pallas_src>

<mosaic_0001>
module attributes {stable_mosaic.version = 11 : i64} {
  func.func @_autocorr_kernel(%arg0: i32, %arg1: memref<2x8x32xf32, #tpu.memory_space<vmem>>, %arg2: memref<2x8x32xf32, #tpu.memory_space<vmem>>, %arg3: memref<2x8x32xf32, #tpu.memory_space<vmem>>, %arg4: memref<32x32xf32, #tpu.memory_space<vmem>>, %arg5: memref<32x32xf32, #tpu.memory_space<vmem>>, %arg6: memref<32x32xf32, #tpu.memory_space<vmem>>, %arg7: memref<1x32xf32, #tpu.memory_space<vmem>>, %arg8: memref<1x32xf32, #tpu.memory_space<vmem>>, %arg9: memref<1x32xf32, #tpu.memory_space<vmem>>, %arg10: memref<8x8xf32, #tpu.memory_space<vmem>>, %arg11: memref<8x8xf32, #tpu.memory_space<vmem>>, %arg12: memref<2x32xf32, #tpu.memory_space<vmem>>) attributes {dimension_semantics = [#tpu.dimension_semantics<parallel>], iteration_bounds = array<i64: 1>, scalar_prefetch = 0 : i64, scratch_operands = 0 : i64, tpu.core_type = #tpu.core_type<tc>, window_params = [{transform_indices = @transform_0, window_bounds = array<i64: 2, 8, 32>}, {transform_indices = @transform_1, window_bounds = array<i64: 2, 8, 32>}, {transform_indices = @transform_2, window_bounds = array<i64: 2, 8, 32>}, {pipeline_mode = #tpu.pipeline_mode<synchronous>, transform_indices = @transform_3, window_bounds = array<i64: 32, 32>}, {pipeline_mode = #tpu.pipeline_mode<synchronous>, transform_indices = @transform_4, window_bounds = array<i64: 32, 32>}, {pipeline_mode = #tpu.pipeline_mode<synchronous>, transform_indices = @transform_5, window_bounds = array<i64: 32, 32>}, {pipeline_mode = #tpu.pipeline_mode<synchronous>, transform_indices = @transform_6, window_bounds = array<i64: 1, 32>}, {pipeline_mode = #tpu.pipeline_mode<synchronous>, transform_indices = @transform_7, window_bounds = array<i64: 1, 32>}, {pipeline_mode = #tpu.pipeline_mode<synchronous>, transform_indices = @transform_8, window_bounds = array<i64: 1, 32>}, {pipeline_mode = #tpu.pipeline_mode<synchronous>, transform_indices = @transform_9, window_bounds = array<i64: 8, 8>}, {pipeline_mode = #tpu.pipeline_mode<synchronous>, transform_indices = @transform_10, window_bounds = array<i64: 8, 8>}, {transform_indices = @transform_11, window_bounds = array<i64: 2, 32>}]} {
    %c0 = arith.constant 0 : index
    %c0_0 = arith.constant 0 : index
    %c0_1 = arith.constant 0 : index
    %0 = vector.load %arg1[%c0, %c0_0, %c0_1] : memref<2x8x32xf32, #tpu.memory_space<vmem>>, vector<2x8x32xf32>
    %1 = vector.shape_cast %0 : vector<2x8x32xf32> to vector<16x32xf32>
    %c0_2 = arith.constant 0 : index
    %c0_3 = arith.constant 0 : index
    %c0_4 = arith.constant 0 : index
    %2 = vector.load %arg2[%c0_2, %c0_3, %c0_4] : memref<2x8x32xf32, #tpu.memory_space<vmem>>, vector<2x8x32xf32>
    %3 = vector.shape_cast %2 : vector<2x8x32xf32> to vector<16x32xf32>
    %c0_5 = arith.constant 0 : index
    %c0_6 = arith.constant 0 : index
    %c0_7 = arith.constant 0 : index
    %4 = vector.load %arg3[%c0_5, %c0_6, %c0_7] : memref<2x8x32xf32, #tpu.memory_space<vmem>>, vector<2x8x32xf32>
    %5 = vector.shape_cast %4 : vector<2x8x32xf32> to vector<16x32xf32>
    %c0_8 = arith.constant 0 : index
    %c0_9 = arith.constant 0 : index
    %6 = vector.load %arg4[%c0_8, %c0_9] : memref<32x32xf32, #tpu.memory_space<vmem>>, vector<32x32xf32>
    %cst = arith.constant dense<0.000000e+00> : vector<16x32xf32>
    %7 = tpu.matmul %1, %6, %cst {dimension_numbers = #tpu.dot_dimension_numbers<[1], [0], [0], [1], [0, 0, 1, 1], [], []>} : vector<16x32xf32>, vector<32x32xf32>, vector<16x32xf32> -> vector<16x32xf32>
    %c0_10 = arith.constant 0 : index
    %c0_11 = arith.constant 0 : index
    %8 = vector.load %arg7[%c0_10, %c0_11] : memref<1x32xf32, #tpu.memory_space<vmem>>, vector<1x32xf32>
    %9 = vector.broadcast %8 : vector<1x32xf32> to vector<16x32xf32>
    %10 = arith.addf %7, %9 : vector<16x32xf32>
    %c0_12 = arith.constant 0 : index
    %c0_13 = arith.constant 0 : index
    %11 = vector.load %arg5[%c0_12, %c0_13] : memref<32x32xf32, #tpu.memory_space<vmem>>, vector<32x32xf32>
    %cst_14 = arith.constant dense<0.000000e+00> : vector<16x32xf32>
    %12 = tpu.matmul %3, %11, %cst_14 {dimension_numbers = #tpu.dot_dimension_numbers<[1], [0], [0], [1], [0, 0, 1, 1], [], []>} : vector<16x32xf32>, vector<32x32xf32>, vector<16x32xf32> -> vector<16x32xf32>
    %c0_15 = arith.constant 0 : index
    %c0_16 = arith.constant 0 : index
    %13 = vector.load %arg8[%c0_15, %c0_16] : memref<1x32xf32, #tpu.memory_space<vmem>>, vector<1x32xf32>
    %14 = vector.broadcast %13 : vector<1x32xf32> to vector<16x32xf32>
    %15 = arith.addf %12, %14 : vector<16x32xf32>
    %c0_17 = arith.constant 0 : index
    %c0_18 = arith.constant 0 : index
    %16 = vector.load %arg6[%c0_17, %c0_18] : memref<32x32xf32, #tpu.memory_space<vmem>>, vector<32x32xf32>
    %cst_19 = arith.constant dense<0.000000e+00> : vector<16x32xf32>
    %17 = tpu.matmul %5, %16, %cst_19 {dimension_numbers = #tpu.dot_dimension_numbers<[1], [0], [0], [1], [0, 0, 1, 1], [], []>} : vector<16x32xf32>, vector<32x32xf32>, vector<16x32xf32> -> vector<16x32xf32>
    %c0_20 = arith.constant 0 : index
    %c0_21 = arith.constant 0 : index
    %18 = vector.load %arg9[%c0_20, %c0_21] : memref<1x32xf32, #tpu.memory_space<vmem>>, vector<1x32xf32>
    %19 = vector.broadcast %18 : vector<1x32xf32> to vector<16x32xf32>
    %20 = arith.addf %17, %19 : vector<16x32xf32>
    %c0_22 = arith.constant 0 : index
    %c0_23 = arith.constant 0 : index
    %21 = vector.load %arg10[%c0_22, %c0_23] : memref<8x8xf32, #tpu.memory_space<vmem>>, vector<8x8xf32>
    %c0_24 = arith.constant 0 : index
    %c0_25 = arith.constant 0 : index
    %22 = vector.load %arg11[%c0_24, %c0_25] : memref<8x8xf32, #tpu.memory_space<vmem>>, vector<8x8xf32>
    %23 = tpu.iota {dimensions = array<i32: 0>} : vector<8x32xi32>
    %24 = tpu.iota {dimensions = array<i32: 1>} : vector<1x32xi32>
    %c8_i32 = arith.constant 8 : i32
    %c0_i32 = arith.constant 0 : i32
    %25 = arith.cmpi eq, %c8_i32, %c0_i32 : i32
    %c1_i32 = arith.constant 1 : i32
    %26 = arith.select %25, %c1_i32, %c8_i32 : i32
    %27 = vector.broadcast %26 : i32 to vector<1x32xi32>
    %28 = arith.remsi %24, %27 : vector<1x32xi32>
    %c0_i32_26 = arith.constant 0 : i32
    %29 = vector.broadcast %c0_i32_26 : i32 to vector<1x32xi32>
    %30 = arith.cmpi ne, %28, %29 : vector<1x32xi32>
    %c0_i32_27 = arith.constant 0 : i32
    %31 = vector.broadcast %c0_i32_27 : i32 to vector<1x32xi32>
    %32 = arith.cmpi slt, %28, %31 : vector<1x32xi32>
    %c0_i32_28 = arith.constant 0 : i32
    %33 = arith.cmpi slt, %26, %c0_i32_28 : i32
    %34 = vector.broadcast %33 : i1 to vector<1x32xi1>
    %35 = vector.broadcast %34 : vector<1x32xi1> to vector<1x32xi1>
    %36 = arith.xori %32, %35 : vector<1x32xi1>
    %37 = arith.andi %36, %30 : vector<1x32xi1>
    %38 = vector.broadcast %26 : i32 to vector<1x32xi32>
    %39 = arith.addi %28, %38 : vector<1x32xi32>
    %40 = arith.select %37, %39, %28 : vector<1x32xi1>, vector<1x32xi32>
    %41 = vector.extract_strided_slice %10 {offsets = [0, 0], sizes = [8, 32], strides = [1, 1]} : vector<16x32xf32> to vector<8x32xf32>
    %42 = vector.extract_strided_slice %15 {offsets = [0, 0], sizes = [8, 32], strides = [1, 1]} : vector<16x32xf32> to vector<8x32xf32>
    %43 = vector.extract_strided_slice %20 {offsets = [0, 0], sizes = [8, 32], strides = [1, 1]} : vector<16x32xf32> to vector<8x32xf32>
    %cst_29 = arith.constant dense<0.000000e+00> : vector<8x32xf32>
    %44 = tpu.matmul %21, %41, %cst_29 {dimension_numbers = #tpu.dot_dimension_numbers<[1], [0], [0], [1], [0, 0, 1, 1], [], []>} : vector<8x8xf32>, vector<8x32xf32>, vector<8x32xf32> -> vector<8x32xf32>
    %cst_30 = arith.constant dense<0.000000e+00> : vector<8x32xf32>
    %45 = tpu.matmul %22, %41, %cst_30 {dimension_numbers = #tpu.dot_dimension_numbers<[1], [0], [0], [1], [0, 0, 1, 1], [], []>} : vector<8x8xf32>, vector<8x32xf32>, vector<8x32xf32> -> vector<8x32xf32>
    %cst_31 = arith.constant dense<0.000000e+00> : vector<8x32xf32>
    %46 = tpu.matmul %21, %42, %cst_31 {dimension_numbers = #tpu.dot_dimension_numbers<[1], [0], [0], [1], [0, 0, 1, 1], [], []>} : vector<8x8xf32>, vector<8x32xf32>, vector<8x32xf32> -> vector<8x32xf32>
    %cst_32 = arith.constant dense<0.000000e+00> : vector<8x32xf32>
    %47 = tpu.matmul %22, %42, %cst_32 {dimension_numbers = #tpu.dot_dimension_numbers<[1], [0], [0], [1], [0, 0, 1, 1], [], []>} : vector<8x8xf32>, vector<8x32xf32>, vector<8x32xf32> -> vector<8x32xf32>
    %48 = arith.mulf %44, %46 : vector<8x32xf32>
    %49 = arith.mulf %45, %47 : vector<8x32xf32>
    %50 = arith.addf %48, %49 : vector<8x32xf32>
    %51 = arith.mulf %44, %47 : vector<8x32xf32>
    %52 = arith.mulf %45, %46 : vector<8x32xf32>
    %53 = arith.subf %51, %52 : vector<8x32xf32>
    %cst_33 = arith.constant dense<0.000000e+00> : vector<8x32xf32>
    %54 = tpu.matmul %21, %50, %cst_33 {dimension_numbers = #tpu.dot_dimension_numbers<[1], [0], [0], [1], [0, 0, 1, 1], [], []>} : vector<8x8xf32>, vector<8x32xf32>, vector<8x32xf32> -> vector<8x32xf32>
    %cst_34 = arith.constant dense<0.000000e+00> : vector<8x32xf32>
    %55 = tpu.matmul %22, %53, %cst_34 {dimension_numbers = #tpu.dot_dimension_numbers<[1], [0], [0], [1], [0, 0, 1, 1], [], []>} : vector<8x8xf32>, vector<8x32xf32>, vector<8x32xf32> -> vector<8x32xf32>
    %56 = arith.subf %54, %55 : vector<8x32xf32>
    %cst_35 = arith.constant 1.250000e-01 : f32
    %57 = vector.broadcast %cst_35 : f32 to vector<8x32xf32>
    %58 = arith.mulf %56, %57 : vector<8x32xf32>
    %cst_36 = arith.constant dense<0xFF800000> : vector<32xf32>
    %59 = vector.multi_reduction <maximumf>, %58, %cst_36 [0] : vector<8x32xf32> to vector<32xf32>
    %60 = vector.shape_cast %59 : vector<32xf32> to vector<1x32xf32>
    %cst_37 = arith.constant 0.000000e+00 : f32
    %61 = vector.broadcast %cst_37 : f32 to vector<8x32xf32>
    %cst_38 = arith.constant 0.000000e+00 : f32
    %62 = vector.broadcast %cst_38 : f32 to vector<1x32xf32>
    %cst_39 = arith.constant dense<0xFF800000> : vector<32xf32>
    %63 = vector.multi_reduction <maximumf>, %58, %cst_39 [0] : vector<8x32xf32> to vector<32xf32>
    %64 = vector.shape_cast %63 : vector<32xf32> to vector<1x32xf32>
    %65 = vector.broadcast %64 : vector<1x32xf32> to vector<8x32xf32>
    %66 = arith.cmpf oeq, %58, %65 : vector<8x32xf32>
    %c8_i32_40 = arith.constant 8 : i32
    %67 = vector.broadcast %c8_i32_40 : i32 to vector<8x32xi32>
    %68 = arith.select %66, %23, %67 : vector<8x32xi1>, vector<8x32xi32>
    %cst_41 = arith.constant dense<2147483647> : vector<32xi32>
    %69 = vector.multi_reduction <minsi>, %68, %cst_41 [0] : vector<8x32xi32> to vector<32xi32>
    %70 = vector.shape_cast %69 : vector<32xi32> to vector<1x32xi32>
    %71 = arith.subf %64, %60 : vector<1x32xf32>
    %72 = math.exp %71 : vector<1x32xf32>
    %73 = arith.addf %62, %72 : vector<1x32xf32>
    %74 = arith.addi %70, %40 : vector<1x32xi32>
    %c7_i32 = arith.constant 7 : i32
    %75 = vector.broadcast %c7_i32 : i32 to vector<1x32xi32>
    %76 = arith.minsi %74, %75 : vector<1x32xi32>
    %77 = vector.broadcast %76 : vector<1x32xi32> to vector<8x32xi32>
    %78 = arith.cmpi eq, %23, %77 : vector<8x32xi32>
    %cst_42 = arith.constant 0.000000e+00 : f32
    %79 = vector.shape_cast %72 : vector<1x32xf32> to vector<1x32xf32>
    %80 = vector.broadcast %79 : vector<1x32xf32> to vector<8x32xf32>
    %81 = vector.broadcast %cst_42 : f32 to vector<8x32xf32>
    %82 = arith.select %78, %80, %81 : vector<8x32xi1>, vector<8x32xf32>
    %83 = arith.addf %61, %82 : vector<8x32xf32>
    %84 = vector.broadcast %70 : vector<1x32xi32> to vector<8x32xi32>
    %85 = arith.cmpi eq, %23, %84 : vector<8x32xi32>
    %cst_43 = arith.constant 0xFF800000 : f32
    %86 = vector.broadcast %cst_43 : f32 to vector<8x32xf32>
    %87 = arith.select %85, %86, %58 : vector<8x32xi1>, vector<8x32xf32>
    %cst_44 = arith.constant dense<0xFF800000> : vector<32xf32>
    %88 = vector.multi_reduction <maximumf>, %87, %cst_44 [0] : vector<8x32xf32> to vector<32xf32>
    %89 = vector.shape_cast %88 : vector<32xf32> to vector<1x32xf32>
    %90 = vector.broadcast %89 : vector<1x32xf32> to vector<8x32xf32>
    %91 = arith.cmpf oeq, %87, %90 : vector<8x32xf32>
    %c8_i32_45 = arith.constant 8 : i32
    %92 = vector.broadcast %c8_i32_45 : i32 to vector<8x32xi32>
    %93 = arith.select %91, %23, %92 : vector<8x32xi1>, vector<8x32xi32>
    %cst_46 = arith.constant dense<2147483647> : vector<32xi32>
    %94 = vector.multi_reduction <minsi>, %93, %cst_46 [0] : vector<8x32xi32> to vector<32xi32>
    %95 = vector.shape_cast %94 : vector<32xi32> to vector<1x32xi32>
    %96 = arith.subf %89, %60 : vector<1x32xf32>
    %97 = math.exp %96 : vector<1x32xf32>
    %98 = arith.addf %73, %97 : vector<1x32xf32>
    %99 = arith.addi %95, %40 : vector<1x32xi32>
    %c7_i32_47 = arith.constant 7 : i32
    %100 = vector.broadcast %c7_i32_47 : i32 to vector<1x32xi32>
    %101 = arith.minsi %99, %100 : vector<1x32xi32>
    %102 = vector.broadcast %101 : vector<1x32xi32> to vector<8x32xi32>
    %103 = arith.cmpi eq, %23, %102 : vector<8x32xi32>
    %cst_48 = arith.constant 0.000000e+00 : f32
    %104 = vector.shape_cast %97 : vector<1x32xf32> to vector<1x32xf32>
    %105 = vector.broadcast %104 : vector<1x32xf32> to vector<8x32xf32>
    %106 = vector.broadcast %cst_48 : f32 to vector<8x32xf32>
    %107 = arith.select %103, %105, %106 : vector<8x32xi1>, vector<8x32xf32>
    %108 = arith.addf %83, %107 : vector<8x32xf32>
    %109 = vector.broadcast %95 : vector<1x32xi32> to vector<8x32xi32>
    %110 = arith.cmpi eq, %23, %109 : vector<8x32xi32>
    %cst_49 = arith.constant 0xFF800000 : f32
    %111 = vector.broadcast %cst_49 : f32 to vector<8x32xf32>
    %112 = arith.select %110, %111, %87 : vector<8x32xi1>, vector<8x32xf32>
    %cst_50 = arith.constant dense<0xFF800000> : vector<32xf32>
    %113 = vector.multi_reduction <maximumf>, %112, %cst_50 [0] : vector<8x32xf32> to vector<32xf32>
    %114 = vector.shape_cast %113 : vector<32xf32> to vector<1x32xf32>
    %115 = vector.broadcast %114 : vector<1x32xf32> to vector<8x32xf32>
    %116 = arith.cmpf oeq, %112, %115 : vector<8x32xf32>
    %c8_i32_51 = arith.constant 8 : i32
    %117 = vector.broadcast %c8_i32_51 : i32 to vector<8x32xi32>
    %118 = arith.select %116, %23, %117 : vector<8x32xi1>, vector<8x32xi32>
    %cst_52 = arith.constant dense<2147483647> : vector<32xi32>
    %119 = vector.multi_reduction <minsi>, %118, %cst_52 [0] : vector<8x32xi32> to vector<32xi32>
    %120 = vector.shape_cast %119 : vector<32xi32> to vector<1x32xi32>
    %121 = arith.subf %114, %60 : vector<1x32xf32>
    %122 = math.exp %121 : vector<1x32xf32>
    %123 = arith.addf %98, %122 : vector<1x32xf32>
    %124 = arith.addi %120, %40 : vector<1x32xi32>
    %c7_i32_53 = arith.constant 7 : i32
    %125 = vector.broadcast %c7_i32_53 : i32 to vector<1x32xi32>
    %126 = arith.minsi %124, %125 : vector<1x32xi32>
    %127 = vector.broadcast %126 : vector<1x32xi32> to vector<8x32xi32>
    %128 = arith.cmpi eq, %23, %127 : vector<8x32xi32>
    %cst_54 = arith.constant 0.000000e+00 : f32
    %129 = vector.shape_cast %122 : vector<1x32xf32> to vector<1x32xf32>
    %130 = vector.broadcast %129 : vector<1x32xf32> to vector<8x32xf32>
    %131 = vector.broadcast %cst_54 : f32 to vector<8x32xf32>
    %132 = arith.select %128, %130, %131 : vector<8x32xi1>, vector<8x32xf32>
    %133 = arith.addf %108, %132 : vector<8x32xf32>
    %134 = vector.broadcast %120 : vector<1x32xi32> to vector<8x32xi32>
    %135 = arith.cmpi eq, %23, %134 : vector<8x32xi32>
    %cst_55 = arith.constant 0xFF800000 : f32
    %136 = vector.broadcast %cst_55 : f32 to vector<8x32xf32>
    %137 = arith.select %135, %136, %112 : vector<8x32xi1>, vector<8x32xf32>
    %cst_56 = arith.constant dense<0xFF800000> : vector<32xf32>
    %138 = vector.multi_reduction <maximumf>, %137, %cst_56 [0] : vector<8x32xf32> to vector<32xf32>
    %139 = vector.shape_cast %138 : vector<32xf32> to vector<1x32xf32>
    %140 = vector.broadcast %139 : vector<1x32xf32> to vector<8x32xf32>
    %141 = arith.cmpf oeq, %137, %140 : vector<8x32xf32>
    %c8_i32_57 = arith.constant 8 : i32
    %142 = vector.broadcast %c8_i32_57 : i32 to vector<8x32xi32>
    %143 = arith.select %141, %23, %142 : vector<8x32xi1>, vector<8x32xi32>
    %cst_58 = arith.constant dense<2147483647> : vector<32xi32>
    %144 = vector.multi_reduction <minsi>, %143, %cst_58 [0] : vector<8x32xi32> to vector<32xi32>
    %145 = vector.shape_cast %144 : vector<32xi32> to vector<1x32xi32>
    %146 = arith.subf %139, %60 : vector<1x32xf32>
    %147 = math.exp %146 : vector<1x32xf32>
    %148 = arith.addf %123, %147 : vector<1x32xf32>
    %149 = arith.addi %145, %40 : vector<1x32xi32>
    %c7_i32_59 = arith.constant 7 : i32
    %150 = vector.broadcast %c7_i32_59 : i32 to vector<1x32xi32>
    %151 = arith.minsi %149, %150 : vector<1x32xi32>
    %152 = vector.broadcast %151 : vector<1x32xi32> to vector<8x32xi32>
    %153 = arith.cmpi eq, %23, %152 : vector<8x32xi32>
    %cst_60 = arith.constant 0.000000e+00 : f32
    %154 = vector.shape_cast %147 : vector<1x32xf32> to vector<1x32xf32>
    %155 = vector.broadcast %154 : vector<1x32xf32> to vector<8x32xf32>
    %156 = vector.broadcast %cst_60 : f32 to vector<8x32xf32>
    %157 = arith.select %153, %155, %156 : vector<8x32xi1>, vector<8x32xf32>
    %158 = arith.addf %133, %157 : vector<8x32xf32>
    %159 = arith.mulf %158, %43 : vector<8x32xf32>
    %cst_61 = arith.constant dense<0.000000e+00> : vector<32xf32>
    %160 = vector.multi_reduction <add>, %159, %cst_61 [0] : vector<8x32xf32> to vector<32xf32>
    %161 = vector.shape_cast %160 : vector<32xf32> to vector<1x32xf32>
    %162 = arith.divf %161, %148 : vector<1x32xf32>
    %cst_62 = arith.constant 8.000000e+00 : f32
    %163 = vector.broadcast %cst_62 : f32 to vector<1x32xf32>
    %164 = arith.mulf %162, %163 : vector<1x32xf32>
    %c0_63 = arith.constant 0 : index
    %c0_64 = arith.constant 0 : index
    %165 = vector.load %arg12[%c0_63, %c0_64] : memref<2x32xf32, #tpu.memory_space<vmem>>, vector<1x32xf32>
    tpu.vector_store %arg12[%c0_63, %c0_64], %164 {strides = array<i32>} : memref<2x32xf32, #tpu.memory_space<vmem>>, vector<1x32xf32>,
    %166 = vector.extract_strided_slice %10 {offsets = [8, 0], sizes = [8, 32], strides = [1, 1]} : vector<16x32xf32> to vector<8x32xf32>
    %167 = vector.extract_strided_slice %15 {offsets = [8, 0], sizes = [8, 32], strides = [1, 1]} : vector<16x32xf32> to vector<8x32xf32>
    %168 = vector.extract_strided_slice %20 {offsets = [8, 0], sizes = [8, 32], strides = [1, 1]} : vector<16x32xf32> to vector<8x32xf32>
    %cst_65 = arith.constant dense<0.000000e+00> : vector<8x32xf32>
    %169 = tpu.matmul %21, %166, %cst_65 {dimension_numbers = #tpu.dot_dimension_numbers<[1], [0], [0], [1], [0, 0, 1, 1], [], []>} : vector<8x8xf32>, vector<8x32xf32>, vector<8x32xf32> -> vector<8x32xf32>
    %cst_66 = arith.constant dense<0.000000e+00> : vector<8x32xf32>
    %170 = tpu.matmul %22, %166, %cst_66 {dimension_numbers = #tpu.dot_dimension_numbers<[1], [0], [0], [1], [0, 0, 1, 1], [], []>} : vector<8x8xf32>, vector<8x32xf32>, vector<8x32xf32> -> vector<8x32xf32>
    %cst_67 = arith.constant dense<0.000000e+00> : vector<8x32xf32>
    %171 = tpu.matmul %21, %167, %cst_67 {dimension_numbers = #tpu.dot_dimension_numbers<[1], [0], [0], [1], [0, 0, 1, 1], [], []>} : vector<8x8xf32>, vector<8x32xf32>, vector<8x32xf32> -> vector<8x32xf32>
    %cst_68 = arith.constant dense<0.000000e+00> : vector<8x32xf32>
    %172 = tpu.matmul %22, %167, %cst_68 {dimension_numbers = #tpu.dot_dimension_numbers<[1], [0], [0], [1], [0, 0, 1, 1], [], []>} : vector<8x8xf32>, vector<8x32xf32>, vector<8x32xf32> -> vector<8x32xf32>
    %173 = arith.mulf %169, %171 : vector<8x32xf32>
    %174 = arith.mulf %170, %172 : vector<8x32xf32>
    %175 = arith.addf %173, %174 : vector<8x32xf32>
    %176 = arith.mulf %169, %172 : vector<8x32xf32>
    %177 = arith.mulf %170, %171 : vector<8x32xf32>
    %178 = arith.subf %176, %177 : vector<8x32xf32>
    %cst_69 = arith.constant dense<0.000000e+00> : vector<8x32xf32>
    %179 = tpu.matmul %21, %175, %cst_69 {dimension_numbers = #tpu.dot_dimension_numbers<[1], [0], [0], [1], [0, 0, 1, 1], [], []>} : vector<8x8xf32>, vector<8x32xf32>, vector<8x32xf32> -> vector<8x32xf32>
    %cst_70 = arith.constant dense<0.000000e+00> : vector<8x32xf32>
    %180 = tpu.matmul %22, %178, %cst_70 {dimension_numbers = #tpu.dot_dimension_numbers<[1], [0], [0], [1], [0, 0, 1, 1], [], []>} : vector<8x8xf32>, vector<8x32xf32>, vector<8x32xf32> -> vector<8x32xf32>
    %181 = arith.subf %179, %180 : vector<8x32xf32>
    %cst_71 = arith.constant 1.250000e-01 : f32
    %182 = vector.broadcast %cst_71 : f32 to vector<8x32xf32>
    %183 = arith.mulf %181, %182 : vector<8x32xf32>
    %cst_72 = arith.constant dense<0xFF800000> : vector<32xf32>
    %184 = vector.multi_reduction <maximumf>, %183, %cst_72 [0] : vector<8x32xf32> to vector<32xf32>
    %185 = vector.shape_cast %184 : vector<32xf32> to vector<1x32xf32>
    %cst_73 = arith.constant 0.000000e+00 : f32
    %186 = vector.broadcast %cst_73 : f32 to vector<8x32xf32>
    %cst_74 = arith.constant 0.000000e+00 : f32
    %187 = vector.broadcast %cst_74 : f32 to vector<1x32xf32>
    %cst_75 = arith.constant dense<0xFF800000> : vector<32xf32>
    %188 = vector.multi_reduction <maximumf>, %183, %cst_75 [0] : vector<8x32xf32> to vector<32xf32>
    %189 = vector.shape_cast %188 : vector<32xf32> to vector<1x32xf32>
    %190 = vector.broadcast %189 : vector<1x32xf32> to vector<8x32xf32>
    %191 = arith.cmpf oeq, %183, %190 : vector<8x32xf32>
    %c8_i32_76 = arith.constant 8 : i32
    %192 = vector.broadcast %c8_i32_76 : i32 to vector<8x32xi32>
    %193 = arith.select %191, %23, %192 : vector<8x32xi1>, vector<8x32xi32>
    %cst_77 = arith.constant dense<2147483647> : vector<32xi32>
    %194 = vector.multi_reduction <minsi>, %193, %cst_77 [0] : vector<8x32xi32> to vector<32xi32>
    %195 = vector.shape_cast %194 : vector<32xi32> to vector<1x32xi32>
    %196 = arith.subf %189, %185 : vector<1x32xf32>
    %197 = math.exp %196 : vector<1x32xf32>
    %198 = arith.addf %187, %197 : vector<1x32xf32>
    %199 = arith.addi %195, %40 : vector<1x32xi32>
    %c7_i32_78 = arith.constant 7 : i32
    %200 = vector.broadcast %c7_i32_78 : i32 to vector<1x32xi32>
    %201 = arith.minsi %199, %200 : vector<1x32xi32>
    %202 = vector.broadcast %201 : vector<1x32xi32> to vector<8x32xi32>
    %203 = arith.cmpi eq, %23, %202 : vector<8x32xi32>
    %cst_79 = arith.constant 0.000000e+00 : f32
    %204 = vector.shape_cast %197 : vector<1x32xf32> to vector<1x32xf32>
    %205 = vector.broadcast %204 : vector<1x32xf32> to vector<8x32xf32>
    %206 = vector.broadcast %cst_79 : f32 to vector<8x32xf32>
    %207 = arith.select %203, %205, %206 : vector<8x32xi1>, vector<8x32xf32>
    %208 = arith.addf %186, %207 : vector<8x32xf32>
    %209 = vector.broadcast %195 : vector<1x32xi32> to vector<8x32xi32>
    %210 = arith.cmpi eq, %23, %209 : vector<8x32xi32>
    %cst_80 = arith.constant 0xFF800000 : f32
    %211 = vector.broadcast %cst_80 : f32 to vector<8x32xf32>
    %212 = arith.select %210, %211, %183 : vector<8x32xi1>, vector<8x32xf32>
    %cst_81 = arith.constant dense<0xFF800000> : vector<32xf32>
    %213 = vector.multi_reduction <maximumf>, %212, %cst_81 [0] : vector<8x32xf32> to vector<32xf32>
    %214 = vector.shape_cast %213 : vector<32xf32> to vector<1x32xf32>
    %215 = vector.broadcast %214 : vector<1x32xf32> to vector<8x32xf32>
    %216 = arith.cmpf oeq, %212, %215 : vector<8x32xf32>
    %c8_i32_82 = arith.constant 8 : i32
    %217 = vector.broadcast %c8_i32_82 : i32 to vector<8x32xi32>
    %218 = arith.select %216, %23, %217 : vector<8x32xi1>, vector<8x32xi32>
    %cst_83 = arith.constant dense<2147483647> : vector<32xi32>
    %219 = vector.multi_reduction <minsi>, %218, %cst_83 [0] : vector<8x32xi32> to vector<32xi32>
    %220 = vector.shape_cast %219 : vector<32xi32> to vector<1x32xi32>
    %221 = arith.subf %214, %185 : vector<1x32xf32>
    %222 = math.exp %221 : vector<1x32xf32>
    %223 = arith.addf %198, %222 : vector<1x32xf32>
    %224 = arith.addi %220, %40 : vector<1x32xi32>
    %c7_i32_84 = arith.constant 7 : i32
    %225 = vector.broadcast %c7_i32_84 : i32 to vector<1x32xi32>
    %226 = arith.minsi %224, %225 : vector<1x32xi32>
    %227 = vector.broadcast %226 : vector<1x32xi32> to vector<8x32xi32>
    %228 = arith.cmpi eq, %23, %227 : vector<8x32xi32>
    %cst_85 = arith.constant 0.000000e+00 : f32
    %229 = vector.shape_cast %222 : vector<1x32xf32> to vector<1x32xf32>
    %230 = vector.broadcast %229 : vector<1x32xf32> to vector<8x32xf32>
    %231 = vector.broadcast %cst_85 : f32 to vector<8x32xf32>
    %232 = arith.select %228, %230, %231 : vector<8x32xi1>, vector<8x32xf32>
    %233 = arith.addf %208, %232 : vector<8x32xf32>
    %234 = vector.broadcast %220 : vector<1x32xi32> to vector<8x32xi32>
    %235 = arith.cmpi eq, %23, %234 : vector<8x32xi32>
    %cst_86 = arith.constant 0xFF800000 : f32
    %236 = vector.broadcast %cst_86 : f32 to vector<8x32xf32>
    %237 = arith.select %235, %236, %212 : vector<8x32xi1>, vector<8x32xf32>
    %cst_87 = arith.constant dense<0xFF800000> : vector<32xf32>
    %238 = vector.multi_reduction <maximumf>, %237, %cst_87 [0] : vector<8x32xf32> to vector<32xf32>
    %239 = vector.shape_cast %238 : vector<32xf32> to vector<1x32xf32>
    %240 = vector.broadcast %239 : vector<1x32xf32> to vector<8x32xf32>
    %241 = arith.cmpf oeq, %237, %240 : vector<8x32xf32>
    %c8_i32_88 = arith.constant 8 : i32
    %242 = vector.broadcast %c8_i32_88 : i32 to vector<8x32xi32>
    %243 = arith.select %241, %23, %242 : vector<8x32xi1>, vector<8x32xi32>
    %cst_89 = arith.constant dense<2147483647> : vector<32xi32>
    %244 = vector.multi_reduction <minsi>, %243, %cst_89 [0] : vector<8x32xi32> to vector<32xi32>
    %245 = vector.shape_cast %244 : vector<32xi32> to vector<1x32xi32>
    %246 = arith.subf %239, %185 : vector<1x32xf32>
    %247 = math.exp %246 : vector<1x32xf32>
    %248 = arith.addf %223, %247 : vector<1x32xf32>
    %249 = arith.addi %245, %40 : vector<1x32xi32>
    %c7_i32_90 = arith.constant 7 : i32
    %250 = vector.broadcast %c7_i32_90 : i32 to vector<1x32xi32>
    %251 = arith.minsi %249, %250 : vector<1x32xi32>
    %252 = vector.broadcast %251 : vector<1x32xi32> to vector<8x32xi32>
    %253 = arith.cmpi eq, %23, %252 : vector<8x32xi32>
    %cst_91 = arith.constant 0.000000e+00 : f32
    %254 = vector.shape_cast %247 : vector<1x32xf32> to vector<1x32xf32>
    %255 = vector.broadcast %254 : vector<1x32xf32> to vector<8x32xf32>
    %256 = vector.broadcast %cst_91 : f32 to vector<8x32xf32>
    %257 = arith.select %253, %255, %256 : vector<8x32xi1>, vector<8x32xf32>
    %258 = arith.addf %233, %257 : vector<8x32xf32>
    %259 = vector.broadcast %245 : vector<1x32xi32> to vector<8x32xi32>
    %260 = arith.cmpi eq, %23, %259 : vector<8x32xi32>
    %cst_92 = arith.constant 0xFF800000 : f32
    %261 = vector.broadcast %cst_92 : f32 to vector<8x32xf32>
    %262 = arith.select %260, %261, %237 : vector<8x32xi1>, vector<8x32xf32>
    %cst_93 = arith.constant dense<0xFF800000> : vector<32xf32>
    %263 = vector.multi_reduction <maximumf>, %262, %cst_93 [0] : vector<8x32xf32> to vector<32xf32>
    %264 = vector.shape_cast %263 : vector<32xf32> to vector<1x32xf32>
    %265 = vector.broadcast %264 : vector<1x32xf32> to vector<8x32xf32>
    %266 = arith.cmpf oeq, %262, %265 : vector<8x32xf32>
    %c8_i32_94 = arith.constant 8 : i32
    %267 = vector.broadcast %c8_i32_94 : i32 to vector<8x32xi32>
    %268 = arith.select %266, %23, %267 : vector<8x32xi1>, vector<8x32xi32>
    %cst_95 = arith.constant dense<2147483647> : vector<32xi32>
    %269 = vector.multi_reduction <minsi>, %268, %cst_95 [0] : vector<8x32xi32> to vector<32xi32>
    %270 = vector.shape_cast %269 : vector<32xi32> to vector<1x32xi32>
    %271 = arith.subf %264, %185 : vector<1x32xf32>
    %272 = math.exp %271 : vector<1x32xf32>
    %273 = arith.addf %248, %272 : vector<1x32xf32>
    %274 = arith.addi %270, %40 : vector<1x32xi32>
    %c7_i32_96 = arith.constant 7 : i32
    %275 = vector.broadcast %c7_i32_96 : i32 to vector<1x32xi32>
    %276 = arith.minsi %274, %275 : vector<1x32xi32>
    %277 = vector.broadcast %276 : vector<1x32xi32> to vector<8x32xi32>
    %278 = arith.cmpi eq, %23, %277 : vector<8x32xi32>
    %cst_97 = arith.constant 0.000000e+00 : f32
    %279 = vector.shape_cast %272 : vector<1x32xf32> to vector<1x32xf32>
    %280 = vector.broadcast %279 : vector<1x32xf32> to vector<8x32xf32>
    %281 = vector.broadcast %cst_97 : f32 to vector<8x32xf32>
    %282 = arith.select %278, %280, %281 : vector<8x32xi1>, vector<8x32xf32>
    %283 = arith.addf %258, %282 : vector<8x32xf32>
    %284 = arith.mulf %283, %168 : vector<8x32xf32>
    %cst_98 = arith.constant dense<0.000000e+00> : vector<32xf32>
    %285 = vector.multi_reduction <add>, %284, %cst_98 [0] : vector<8x32xf32> to vector<32xf32>
    %286 = vector.shape_cast %285 : vector<32xf32> to vector<1x32xf32>
    %287 = arith.divf %286, %273 : vector<1x32xf32>
    %cst_99 = arith.constant 8.000000e+00 : f32
    %288 = vector.broadcast %cst_99 : f32 to vector<1x32xf32>
    %289 = arith.mulf %287, %288 : vector<1x32xf32>
    %c1 = arith.constant 1 : index
    %c0_100 = arith.constant 0 : index
    %290 = vector.load %arg12[%c1, %c0_100] : memref<2x32xf32, #tpu.memory_space<vmem>>, vector<1x32xf32>
    tpu.vector_store %arg12[%c1, %c0_100], %289 {strides = array<i32>} : memref<2x32xf32, #tpu.memory_space<vmem>>, vector<1x32xf32>,
    return
  }
  func.func @transform_0(%arg0: i32) -> (i32, i32, i32) {
    %c0_i32 = arith.constant 0 : i32
    %c0_i32_0 = arith.constant 0 : i32
    %c0_i32_1 = arith.constant 0 : i32
    return %arg0, %c0_i32, %c0_i32_0 : i32, i32, i32
  }
  func.func @transform_1(%arg0: i32) -> (i32, i32, i32) {
    %c0_i32 = arith.constant 0 : i32
    %c0_i32_0 = arith.constant 0 : i32
    %c0_i32_1 = arith.constant 0 : i32
    return %arg0, %c0_i32, %c0_i32_0 : i32, i32, i32
  }
  func.func @transform_2(%arg0: i32) -> (i32, i32, i32) {
    %c0_i32 = arith.constant 0 : i32
    %c0_i32_0 = arith.constant 0 : i32
    %c0_i32_1 = arith.constant 0 : i32
    return %arg0, %c0_i32, %c0_i32_0 : i32, i32, i32
  }
  func.func @transform_3(%arg0: i32) -> (i32, i32) {
    %c0_i32 = arith.constant 0 : i32
    %c0_i32_0 = arith.constant 0 : i32
    %c0_i32_1 = arith.constant 0 : i32
    return %c0_i32, %c0_i32_0 : i32, i32
  }
  func.func @transform_4(%arg0: i32) -> (i32, i32) {
    %c0_i32 = arith.constant 0 : i32
    %c0_i32_0 = arith.constant 0 : i32
    %c0_i32_1 = arith.constant 0 : i32
    return %c0_i32, %c0_i32_0 : i32, i32
  }
  func.func @transform_5(%arg0: i32) -> (i32, i32) {
    %c0_i32 = arith.constant 0 : i32
    %c0_i32_0 = arith.constant 0 : i32
    %c0_i32_1 = arith.constant 0 : i32
    return %c0_i32, %c0_i32_0 : i32, i32
  }
  func.func @transform_6(%arg0: i32) -> (i32, i32) {
    %c0_i32 = arith.constant 0 : i32
    %c0_i32_0 = arith.constant 0 : i32
    %c0_i32_1 = arith.constant 0 : i32
    return %c0_i32, %c0_i32_0 : i32, i32
  }
  func.func @transform_7(%arg0: i32) -> (i32, i32) {
    %c0_i32 = arith.constant 0 : i32
    %c0_i32_0 = arith.constant 0 : i32
    %c0_i32_1 = arith.constant 0 : i32
    return %c0_i32, %c0_i32_0 : i32, i32
  }
  func.func @transform_8(%arg0: i32) -> (i32, i32) {
    %c0_i32 = arith.constant 0 : i32
    %c0_i32_0 = arith.constant 0 : i32
    %c0_i32_1 = arith.constant 0 : i32
    return %c0_i32, %c0_i32_0 : i32, i32
  }
  func.func @transform_9(%arg0: i32) -> (i32, i32) {
    %c0_i32 = arith.constant 0 : i32
    %c0_i32_0 = arith.constant 0 : i32
    %c0_i32_1 = arith.constant 0 : i32
    return %c0_i32, %c0_i32_0 : i32, i32
  }
  func.func @transform_10(%arg0: i32) -> (i32, i32) {
    %c0_i32 = arith.constant 0 : i32
    %c0_i32_0 = arith.constant 0 : i32
    %c0_i32_1 = arith.constant 0 : i32
    return %c0_i32, %c0_i32_0 : i32, i32
  }
  func.func @transform_11(%arg0: i32) -> (i32, i32) {
    %c0_i32 = arith.constant 0 : i32
    %c0_i32_0 = arith.constant 0 : i32
    return %arg0, %c0_i32 : i32, i32
  }
}

</mosaic_0001>

<bundles_post_ra>
// kernel: tpu_custom_call.1
= control target key start
LH: loop header
LB: loop body
LE: loop exit
PB: predicated region body
PF: predicated region fallthrough
CT: control target
= control target key end

     0   :  { %16 = vsyncpa [#allocation3], 0  ;;  %s2297_s0 = inlined_call_operand.hbm [shape: f32[2,8,32], index: 0, kind: input, shape index: {}]   ;;  %s2298_s1 = inlined_call_operand.hbm [shape: f32[2,8,32], index: 1, kind: input, shape index: {}]   ;;  %s2299_s2 = inlined_call_operand.hbm [shape: f32[2,8,32], index: 2, kind: input, shape index: {}]   ;;  %s2300_s3 = inlined_call_operand.hbm [shape: f32[32,32], index: 3, kind: input, shape index: {}]   ;;  %s2301_s4 = inlined_call_operand.hbm [shape: f32[32,32], index: 4, kind: input, shape index: {}]   ;;  %s2302_s5 = inlined_call_operand.hbm [shape: f32[32,32], index: 5, kind: input, shape index: {}]   ;;  %s2303_s6 = inlined_call_operand.hbm [shape: f32[1,32], index: 6, kind: input, shape index: {}]   ;;  %s2304_s7 = inlined_call_operand.hbm [shape: f32[1,32], index: 7, kind: input, shape index: {}]   ;;  %s2305_s8 = inlined_call_operand.hbm [shape: f32[1,32], index: 8, kind: input, shape index: {}]   ;;  %s2306_s9 = inlined_call_operand.vmem [shape: f32[8,8], index: 9, kind: input, shape index: {}]   ;;  %s2307_s10 = inlined_call_operand.vmem [shape: f32[8,8], index: 10, kind: input, shape index: {}]   ;;  %s2308_s11 = inlined_call_operand.hbm [shape: f32[2,32], index: 11, kind: output, shape index: {}]  }
   0x1   :  { %17 = vsyncpa [#allocation6], 0 }
   0x2   :  { %18 = vsyncpa [#allocation9], 0 }
   0x3   :  { %19 = vsyncpa [#allocation12], 0 }
   0x4   :  { %20 = vsyncpa [#allocation15], 0 }
   0x5   :  { %21 = vsyncpa [#allocation4], 0  ;;  %s2009_s17 = smov [#allocation5]   ;;  %s2010_s19 = smov [#allocation8]  }
   0x6   :  { %s39_s18 = sshll.u32 %s2009_s17, 4  ;;  %s63_s20 = sshll.u32 %s2010_s19, 4  ;;  %s40_s18 = int_to_ptr.vmem [resolvable:$true] %s39_s18  ;;  %s64_s20 = int_to_ptr.vmem [resolvable:$true] %s63_s20 }
   0x7   :  { %s1805_s21 = scalar_lea.vmem %s40_s18, 256  ;;  %p1810_p1 = scmp.lt.s32.totalorder %s40_s18, %s40_s18 }
   0x8   :  { %p1806_p0 = scmp.ne.s32.totalorder %s40_s18, %s1805_s21  ;;  %p1811_p2 = scmp.lt.s32.totalorder %s1805_s21, %s1805_s21 }
   0xa   :  { %p1812_p3 = por %p1811_p2, %p1810_p1 }
   0xc   :  { %p1813_p4 = pnand %p1812_p3, %p1806_p0 }
   0xe   :  { %1816 = shalt.err (!%p1813_p4)
}
   0xf   :  { %s2011_s22 = smov 128   ;;  %s2012_s23 = smov 8  }
  0x10   :  { %45 = dma.hbm_to_vmem [thread:$0]  %s2298_s1, 256, %s40_s18, [#allocation6], %s2011_s22, %s2011_s22, %s2012_s23  }
  0x11   :  { %s1825_s26 = scalar_lea.vmem %s64_s20, 512  ;;  %p1830_p6 = scmp.lt.s32.totalorder %s64_s20, %s64_s20 }
  0x12   :  { %p1826_p5 = scmp.ne.s32.totalorder %s64_s20, %s1825_s26  ;;  %p1831_p7 = scmp.lt.s32.totalorder %s1825_s26, %s1825_s26 }
  0x14   :  { %p1832_p8 = por %p1831_p7, %p1830_p6 }
  0x16   :  { %p1833_p9 = pnand %p1832_p8, %p1826_p5 }
  0x18   :  { %1836 = shalt.err (!%p1833_p9)
}
  0x19   :  { %69 = dma.hbm_to_vmem [thread:$0]  %s2300_s3, 512, %s64_s20, [#allocation9], %s2011_s22, %s2011_s22, %s2012_s23  }
  0x1a   :  { %s2013_s29 = smov [#allocation11]   ;;  %s2014_s12 = smov [#allocation14]  }
  0x1b   :  { %s87_s30 = sshll.u32 %s2013_s29, 4  ;;  %s110_s13 = sshll.u32 %s2014_s12, 4  ;;  %s88_s30 = int_to_ptr.vmem [resolvable:$true] %s87_s30  ;;  %s111_s13 = int_to_ptr.vmem [resolvable:$true] %s110_s13 }
  0x1c   :  { %s1845_s1 = scalar_lea.vmem %s88_s30, 512  ;;  %p1850_p11 = scmp.lt.s32.totalorder %s88_s30, %s88_s30 }
  0x1d   :  { %p1846_p10 = scmp.ne.s32.totalorder %s88_s30, %s1845_s1  ;;  %p1851_p12 = scmp.lt.s32.totalorder %s1845_s1, %s1845_s1 }
  0x1f   :  { %p1852_p13 = por %p1851_p12, %p1850_p11 }
  0x21   :  { %p1853_p0 = pnand %p1852_p13, %p1846_p10 }
  0x23   :  { %1856 = shalt.err (!%p1853_p0)
}
  0x24   :  { %93 = dma.hbm_to_vmem [thread:$0]  %s2302_s5, 512, %s88_s30, [#allocation12], %s2011_s22, %s2011_s22, %s2012_s23  }
  0x25   :  { %s1865_s3 = scalar_lea.vmem %s111_s13, 16  ;;  %s1869_s16 = scalar_lea.vmem %s111_s13, 32 }
  0x26   :  { %p1866_p1 = scmp.ne.s32.totalorder %s111_s13, %s1865_s3  ;;  %p1870_p2 = scmp.lt.s32.totalorder %s111_s13, %s111_s13 }
  0x27   :  { %p1871_p3 = scmp.lt.s32.totalorder %s1869_s16, %s1865_s3 }
  0x29   :  { %p1872_p4 = por %p1871_p3, %p1870_p2 }
  0x2b   :  { %p1873_p5 = pnand %p1872_p4, %p1866_p1 }
  0x2d   :  { %1876 = shalt.err (!%p1873_p5)
}
  0x2e   :  { %113 = dma.hbm_to_vmem [thread:$0]  %s2304_s7, 16, %s111_s13, [#allocation15]  }
  0x2f   :  { %s2015_s19 = smov [#allocation2]   ;;  %s2016_s21 = smov [#allocation7]  }
  0x30   :  { %s27_s20 = sshll.u32 %s2015_s19, 4  ;;  %s51_s24 = sshll.u32 %s2016_s21, 4  ;;  %s28_s20 = int_to_ptr.vmem [resolvable:$true] %s27_s20  ;;  %s52_s24 = int_to_ptr.vmem [resolvable:$true] %s51_s24 }
  0x31   :  { %s1885_s25 = scalar_lea.vmem %s28_s20, 256  ;;  %p1890_p7 = scmp.lt.s32.totalorder %s28_s20, %s28_s20 }
  0x32   :  { %p1886_p6 = scmp.ne.s32.totalorder %s28_s20, %s1885_s25  ;;  %p1891_p8 = scmp.lt.s32.totalorder %s1885_s25, %s1885_s25 }
  0x34   :  { %p1892_p9 = por %p1891_p8, %p1890_p7 }
  0x36   :  { %p1893_p10 = pnand %p1892_p9, %p1886_p6 }
  0x38   :  { %1896 = shalt.err (!%p1893_p10)
}
  0x39   :  { %33 = dma.hbm_to_vmem [thread:$0]  %s2297_s0, 256, %s28_s20, [#allocation3], %s2011_s22, %s2011_s22, %s2012_s23  }
  0x3a   :  { %s1905_s7 = scalar_lea.vmem %s52_s24, 256  ;;  %p1910_p12 = scmp.lt.s32.totalorder %s52_s24, %s52_s24 }
  0x3b   :  { %p1906_p11 = scmp.ne.s32.totalorder %s52_s24, %s1905_s7  ;;  %p1911_p13 = scmp.lt.s32.totalorder %s1905_s7, %s1905_s7 }
  0x3d   :  { %p1912_p0 = por %p1911_p13, %p1910_p12 }
  0x3f   :  { %p1913_p1 = pnand %p1912_p0, %p1906_p11 }
  0x41   :  { %1916 = shalt.err (!%p1913_p1)
}
  0x42   :  { %57 = dma.hbm_to_vmem [thread:$0]  %s2299_s2, 256, %s52_s24, [#allocation6], %s2011_s22, %s2011_s22, %s2012_s23  }
  0x43   :  { %s2017_s29 = smov [#allocation10]   ;;  %s2018_s12 = smov [#allocation13]  }
  0x44   :  { %s75_s30 = sshll.u32 %s2017_s29, 4  ;;  %s100_s13 = sshll.u32 %s2018_s12, 4  ;;  %s76_s30 = int_to_ptr.vmem [resolvable:$true] %s75_s30  ;;  %s101_s13 = int_to_ptr.vmem [resolvable:$true] %s100_s13 }
  0x45   :  { %s1925_s0 = scalar_lea.vmem %s76_s30, 512  ;;  %p1930_p3 = scmp.lt.s32.totalorder %s76_s30, %s76_s30 }
  0x46   :  { %p1926_p2 = scmp.ne.s32.totalorder %s76_s30, %s1925_s0  ;;  %p1931_p4 = scmp.lt.s32.totalorder %s1925_s0, %s1925_s0 }
  0x48   :  { %p1932_p5 = por %p1931_p4, %p1930_p3 }
  0x4a   :  { %p1933_p6 = pnand %p1932_p5, %p1926_p2 }
  0x4c   :  { %1936 = shalt.err (!%p1933_p6)
}
  0x4d   :  { %81 = dma.hbm_to_vmem [thread:$0]  %s2301_s4, 512, %s76_s30, [#allocation9], %s2011_s22, %s2011_s22, %s2012_s23  }
  0x4e   :  { %s1945_s2 = scalar_lea.vmem %s101_s13, 16  ;;  %s1949_s15 = scalar_lea.vmem %s101_s13, 32 }
  0x4f   :  { %p1946_p7 = scmp.ne.s32.totalorder %s101_s13, %s1945_s2  ;;  %p1950_p8 = scmp.lt.s32.totalorder %s101_s13, %s101_s13 }
  0x50   :  { %p1951_p9 = scmp.lt.s32.totalorder %s1949_s15, %s1945_s2 }
  0x52   :  { %p1952_p10 = por %p1951_p9, %p1950_p8 }
  0x54   :  { %p1953_p11 = pnand %p1952_p10, %p1946_p7 }
  0x56   :  { %1956 = shalt.err (!%p1953_p11)
}
  0x57   :  { %103 = dma.hbm_to_vmem [thread:$0]  %s2303_s6, 16, %s101_s13, [#allocation12]  }
  0x58   :  { %s2019_s17 = smov [#allocation16]  }
  0x59   :  { %s120_s18 = sshll.u32 %s2019_s17, 4  ;;  %s121_s18 = int_to_ptr.vmem [resolvable:$true] %s120_s18 }
  0x5a   :  { %s1965_s19 = scalar_lea.vmem %s121_s18, 16  ;;  %s1969_s20 = scalar_lea.vmem %s121_s18, 32 }
  0x5b   :  { %p1966_p12 = scmp.ne.s32.totalorder %s121_s18, %s1965_s19  ;;  %p1970_p13 = scmp.lt.s32.totalorder %s121_s18, %s121_s18 }
  0x5c   :  { %p1971_p0 = scmp.lt.s32.totalorder %s1969_s20, %s1965_s19 }
  0x5e   :  { %p1972_p1 = por %p1971_p0, %p1970_p13 }
  0x60   :  { %p1973_p2 = pnand %p1972_p1, %p1966_p12 }
  0x62   :  { %1976 = shalt.err (!%p1973_p2)
}
  0x63   :  { %123 = dma.hbm_to_vmem [thread:$0]  %s2305_s8, 16, %s121_s18, [#allocation15]  }
  0x64   :  { %1997 = dma.done.wait [#allocation3], 256  }
  0x65   :  { %1998 = vsyncadd [#allocation3], 4294967040 }
  0x66   :  { %1999 = dma.done.wait [#allocation6], 512  }
  0x67   :  { %2000 = vsyncadd [#allocation6], 4294966784 }
  0x68   :  { %2001 = dma.done.wait [#allocation9], 1024  }
  0x69   :  { %2002 = vsyncadd [#allocation9], 4294966272 }
  0x6a   :  { %2003 = dma.done.wait [#allocation12], 528  }
  0x6b   :  { %2004 = vsyncadd [#allocation12], 4294966768 }
  0x6c   :  { %2005 = dma.done.wait [#allocation15], 32  }
  0x6d   :  { %2006 = vsyncadd [#allocation15], 4294967264  ;;  %v164_v0 = vld [vmem:[#allocation8 + $0x18] sm:$0xff]  ;;  %v163_v2 = vld [vmem:[#allocation8 + $0x10] sm:$0xff]  ;;  %vm172_vm0 = vcmask 261120   ;;  %v2020_v18 = vmov 0.0  }
  0x6e   :  { %v257_v1 = vld [vmem:[#allocation10 + $0x18] sm:$0xff]  ;;  %1670 = vmatprep.subr.mxu0 %v164_v0  ;;  %v256_v3 = vld [vmem:[#allocation10 + $0x10] sm:$0xff]  ;;  %v162_v4 = vld [vmem:[#allocation8 + $0x8] sm:$0xff]  ;;  %vm2021_vm1 = vmmov 0   ;;  %vm456_vm2 = vcmask 64512  }
  0x6f   :  { %1681 = vmatprep.subr.mxu1 %v257_v1  ;;  %1671 = vmatpush3.msra.mxu0 %v164_v0  ;;  %v255_v5 = vld [vmem:[#allocation10 + $0x8] sm:$0xff]  ;;  %v161_v6 = vld [vmem:[#allocation8] sm:$0xff]  ;;  %v155_v8 = vld [vmem:[#allocation2] sm:$0xff] }
  0x70   :  { %1682 = vmatpush3.msra.mxu1 %v257_v1  ;;  %1672 = vmatprep.subr.mxu0 %v163_v2  ;;  %v254_v7 = vld [vmem:[#allocation10] sm:$0xff]  ;;  %v156_v10 = vld [vmem:[#allocation2 + $0x8] sm:$0xff]  ;;  %v158_v11 = vld [vmem:[#allocation5 + $0x8] sm:$0xff] }
  0x71   :  { %1683 = vmatprep.subr.mxu1 %v256_v3  ;;  %1673 = vmatpush3.msra.mxu0 %v163_v2  ;;  %v157_v9 = vld [vmem:[#allocation5] sm:$0xff]  ;;  %v349_v12 = vld [vmem:[#allocation11 + $0x18] sm:$0xff]  ;;  %v348_v13 = vld [vmem:[#allocation11 + $0x10] sm:$0xff] }
  0x72   :  { %1684 = vmatpush3.msra.mxu1 %v256_v3  ;;  %1674 = vmatprep.subr.mxu0 %v162_v4  ;;  %v347_v14 = vld [vmem:[#allocation11 + $0x8] sm:$0xff]  ;;  %v346_v15 = vld [vmem:[#allocation11] sm:$0xff]  ;;  %v159_v16 = vld [vmem:[#allocation7] sm:$0xff] }
  0x73   :  { %1685 = vmatprep.subr.mxu1 %v255_v5  ;;  %1675 = vmatpush3.msra.mxu0 %v162_v4  ;;  %v160_v17 = vld [vmem:[#allocation7 + $0x8] sm:$0xff]  ;;  %v1607_v19 = vld [vmem:[#allocation13] ss:$0 sm:$0xff]  ;;  %v1610_v22 = vld [vmem:[#allocation14] ss:$0 sm:$0xff]  ;;  %v440_v4 = vlaneseq }
  0x74   :  { %1686 = vmatpush3.msra.mxu1 %v255_v5  ;;  %1676 = vmatprep.subr.mxu0 %v161_v6  ;;  %v2143_v29 = vld [vmem:[%s2306_s9] sm:$0xff]  ;;  %v2170_v31 = vld [vmem:[#allocation16] ss:$0 sm:$0xff]  ;;  %s2022_s9 = smov [#allocation17]  }
  0x75   :  { %1687 = vmatprep.subr.mxu1 %v254_v7  ;;  %1677 = vmatpush3.msra.mxu0 %v161_v6  ;;  %v2153_v30 = vld [vmem:[%s2307_s10] sm:$0xff]  ;;  %s1594_s10 = sshll.u32 %s2022_s9, 4  ;;  %s1595_s10 = int_to_ptr.vmem [resolvable:$true] %s1594_s10 }
  0x76   :  { %1678 = vmatprep.mubr.msk.f32.mxu0 %vm172_vm0, %v155_v8  ;;  %1688 = vmatpush3.msra.mxu1 %v254_v7  ;;  %s1977_s24 = scalar_lea.vmem %s1595_s10, 32  ;;  %p1982_p4 = scmp.lt.s32.totalorder %s1595_s10, %s1595_s10 }
  0x77   :  { %1689 = vmatprep.mubr.msk.f32.mxu1 %vm172_vm0, %v157_v9  ;;  %1679 = vmatmul.mubr.msk.f32.vlgmr.msra.gmra.mxu0 %vm172_vm0, %v156_v10  ;;  %p1978_p3 = scmp.ne.s32.totalorder %s1595_s10, %s1977_s24  ;;  %p1983_p5 = scmp.lt.s32.totalorder %s1977_s24, %s1977_s24 }
  0x78   :  { %1690 = vmatmul.mubr.msk.f32.vlgmr.msra.gmra.mxu1 %vm172_vm0, %v158_v11  ;;  %1692 = vmatprep.subr.mxu0 %v349_v12 }
  0x79   :  { %1693 = vmatpush3.msra.mxu0 %v349_v12  ;;  %1700 = vmatprep.mubr.msk.f32.mxu0 %vm172_vm0, %v159_v16  ;;  %v2209_v12 = vshrl.u32 %v440_v4, 7  ;;  %p1984_p6 = por %p1983_p5, %p1982_p4 }
  0x7a   :  { %1694 = vmatprep.subr.mxu0 %v348_v13  ;;  %1703 = vmatprep.subr.mxu1 %v2020_v18 }
  0x7b   :  { %1695 = vmatpush3.msra.mxu0 %v348_v13  ;;  %1705 = vmatprep.mubr.msk.f32.mxu1 %vm2021_vm1, %v2020_v18  ;;  %p1985_p7 = pnand %p1984_p6, %p1978_p3 }
  0x7c   :  { %1696 = vmatprep.subr.mxu0 %v347_v14 }
  0x7d   :  { %1697 = vmatpush3.msra.mxu0 %v347_v14 }
  0x7e   :  { %1698 = vmatprep.subr.mxu0 %v346_v15 }
  0x7f   :  { %1699 = vmatpush3.msra.mxu0 %v346_v15 }
  0x80   :  { %1701 = vmatmul.mubr.msk.f32.vlgmr.msra.gmra.mxu0 %vm172_vm0, %v160_v17  ;;  %1713 = vmatprep.subr.mxu0 %v2020_v18 }
  0x81   :  { %1715 = vmatprep.mubr.msk.f32.mxu0 %vm2021_vm1, %v2020_v18 }
 0x137   :  { %v1680_v20 = vpop.f32.mrf.mxu0 }
 0x138   :  { %v1691_v21 = vpop.f32.mrf.mxu1  ;;  %v251_v23 = vadd.f32 %v1680_v20, %v1607_v19 }
 0x139   :  { %v343_v24 = vadd.f32 %v1691_v21, %v1610_v22  ;;  %v245_v25 = vpop.f32.mrf.mxu0 }
 0x13a   :  { %v337_v26 = vpop.f32.mrf.mxu1  ;;  %v246_v27 = vadd.f32 %v1607_v19, %v245_v25 }
 0x13b   :  { %v338_v28 = vadd.f32 %v1610_v22, %v337_v26 }
 0x13c   :  { %1704 = vmatpush3.msra.mxu1 %v246_v27 }
 0x13d   :  { %1714 = vmatpush3.msra.mxu0 %v338_v28  ;;  %1706 = vmatmul.mubr.msk.f32.vlgmr.msra.gmra.mxu1 %vm456_vm2, %v2143_v29 }
 0x13e   :  { %1708 = vmatprep.subr.mxu1 %v2020_v18  ;;  %1716 = vmatmul.mubr.msk.f32.vlgmr.msra.gmra.mxu0 %vm456_vm2, %v2143_v29 }
 0x13f   :  { %1709 = vmatpush3.msra.mxu1 %v246_v27  ;;  %1710 = vmatprep.mubr.msk.f32.mxu1 %vm2021_vm1, %v2020_v18 }
 0x140   :  { %1718 = vmatprep.subr.mxu1 %v2020_v18  ;;  %1723 = vmatprep.subr.mxu0 %v2020_v18  ;;  %v1702_v32 = vpop.f32.mrf.mxu0 }
 0x141   :  { %1725 = vmatprep.mubr.msk.f32.mxu0 %vm2021_vm1, %v2020_v18  ;;  %1711 = vmatmul.mubr.msk.f32.vlgmr.msra.gmra.mxu1 %vm456_vm2, %v2153_v30  ;;  %v2173_v33 = vadd.f32 %v1702_v32, %v2170_v31 }
 0x142   :  { %1719 = vmatpush3.msra.mxu1 %v338_v28  ;;  %1720 = vmatprep.mubr.msk.f32.mxu1 %vm2021_vm1, %v2020_v18  ;;  %v2175_v34 = vpop.f32.mrf.mxu0 }
 0x143   :  { %1728 = vmatprep.subr.mxu1 %v2020_v18 }
 0x145   :  { %1721 = vmatmul.mubr.msk.f32.vlgmr.msra.gmra.mxu1 %vm456_vm2, %v2153_v30 }
 0x146   :  { %1730 = vmatprep.mubr.msk.f32.mxu1 %vm2021_vm1, %v2020_v18 }
 0x1fd   :  { %v526_v35 = vpop.f32.mrf.mxu1 }
 0x1fe   :  { %v669_v36 = vpop.f32.mrf.mxu0 }
 0x1ff   :  { %v1707_v37 = vpop.f32.mrf.mxu1  ;;  %v743_v42 = vmul.f32 %v669_v36, %v526_v35 }
 0x200   :  { %v1717_v38 = vpop.f32.mrf.mxu0 }
 0x201   :  { %v599_v39 = vpop.f32.mrf.mxu1 }
 0x202   :  { %v747_v43 = vmul.f32 %v669_v36, %v599_v39 }
 0x203   :  { %v1712_v40 = vpop.f32.mrf.mxu1 }
 0x205   :  { %v739_v41 = vpop.f32.mrf.mxu1 }
 0x206   :  { %v744_v44 = vmul.f32 %v739_v41, %v599_v39  ;;  %v746_v45 = vmul.f32 %v739_v41, %v526_v35 }
 0x207   :  { %v1722_v46 = vpop.f32.mrf.mxu1 }
 0x208   :  { %v745_v47 = vadd.f32 %v744_v44, %v743_v42  ;;  %v748_v48 = vsub.f32 %v746_v45, %v747_v43 }
 0x20a   :  { %1724 = vmatpush3.msra.mxu0 %v745_v47  ;;  %1729 = vmatpush3.msra.mxu1 %v748_v48 }
 0x20b   :  { %1726 = vmatmul.mubr.msk.f32.vlgmr.msra.gmra.mxu0 %vm456_vm2, %v2143_v29  ;;  %1731 = vmatmul.mubr.msk.f32.vlgmr.msra.gmra.mxu1 %vm456_vm2, %v2153_v30 }
 0x20c   :  { %1733 = vmatprep.subr.mxu0 %v2020_v18  ;;  %1738 = vmatprep.subr.mxu1 %v2020_v18 }
 0x20d   :  { %1734 = vmatpush3.msra.mxu0 %v251_v23  ;;  %1739 = vmatpush3.msra.mxu1 %v251_v23 }
 0x20e   :  { %1735 = vmatprep.mubr.msk.f32.mxu0 %vm2021_vm1, %v2020_v18  ;;  %1740 = vmatprep.mubr.msk.f32.mxu1 %vm2021_vm1, %v2020_v18 }
 0x20f   :  { %1743 = vmatprep.subr.mxu0 %v2020_v18  ;;  %1748 = vmatprep.subr.mxu1 %v2020_v18 }
 0x210   :  { %1736 = vmatmul.mubr.msk.f32.vlgmr.msra.gmra.mxu0 %vm456_vm2, %v2143_v29  ;;  %1741 = vmatmul.mubr.msk.f32.vlgmr.msra.gmra.mxu1 %vm456_vm2, %v2153_v30 }
 0x211   :  { %1744 = vmatpush3.msra.mxu0 %v343_v24  ;;  %1749 = vmatpush3.msra.mxu1 %v343_v24 }
 0x212   :  { %1745 = vmatprep.mubr.msk.f32.mxu0 %vm2021_vm1, %v2020_v18  ;;  %1750 = vmatprep.mubr.msk.f32.mxu1 %vm2021_vm1, %v2020_v18 }
 0x213   :  { %1753 = vmatprep.subr.mxu0 %v2020_v18  ;;  %1758 = vmatprep.subr.mxu1 %v2020_v18 }
 0x214   :  { %1746 = vmatmul.mubr.msk.f32.vlgmr.msra.gmra.mxu0 %vm456_vm2, %v2143_v29  ;;  %1751 = vmatmul.mubr.msk.f32.vlgmr.msra.gmra.mxu1 %vm456_vm2, %v2153_v30 }
 0x215   :  { %1755 = vmatprep.mubr.msk.f32.mxu0 %vm2021_vm1, %v2020_v18  ;;  %1760 = vmatprep.mubr.msk.f32.mxu1 %vm2021_vm1, %v2020_v18 }
 0x2cb   :  { %v815_v49 = vpop.f32.mrf.mxu0  ;;  %v885_v50 = vpop.f32.mrf.mxu1 }
 0x2cc   :  { %v889_v51 = vsub.f32 %v815_v49, %v885_v50 }
 0x2cd   :  { %v1727_v52 = vpop.f32.mrf.mxu0  ;;  %v1732_v53 = vpop.f32.mrf.mxu1 }
 0x2ce   :  { %v890_v54 = vmul.f32 0.125, %v889_v51 }
 0x2d0   :  { %v891_v55 = vsel %vm172_vm0, %v890_v54, -inf  ;;  %v1092_v56 = vpop.f32.mrf.mxu0  ;;  %v1162_v57 = vpop.f32.mrf.mxu1 }
 0x2d1   :  { %v892_v58 = vrot.slane %v891_v55, 4 }
 0x2d2   :  { %v1737_v59 = vpop.f32.mrf.mxu0  ;;  %v1742_v60 = vpop.f32.mrf.mxu1 }
 0x2d3   :  { %v893_v61 = vmax.f32 %v891_v55, %v892_v58 }
 0x2d4   :  { %v1232_v62 = vpop.f32.mrf.mxu0  ;;  %v1302_v63 = vpop.f32.mrf.mxu1 }
 0x2d5   :  { %v894_v0 = vrot.slane %v893_v61, 2  ;;  %v1306_v1 = vmul.f32 %v1232_v62, %v1092_v56  ;;  %v1310_v2 = vmul.f32 %v1232_v62, %v1162_v57  ;;  %v1307_v3 = vmul.f32 %v1302_v63, %v1162_v57 }
 0x2d6   :  { %v1309_v5 = vmul.f32 %v1302_v63, %v1092_v56  ;;  %v1747_v6 = vpop.f32.mrf.mxu0  ;;  %v1752_v7 = vpop.f32.mrf.mxu1 }
 0x2d7   :  { %v895_v8 = vmax.f32 %v893_v61, %v894_v0  ;;  %v1308_v9 = vadd.f32 %v1307_v3, %v1306_v1 }
 0x2d8   :  { %v1311_v10 = vsub.f32 %v1309_v5, %v1310_v2  ;;  %v443_v2 = vand.u32 127, %v440_v4 }
 0x2d9   :  { %v896_v11 = vrot.slane %v895_v8, 1  ;;  %1754 = vmatpush3.msra.mxu0 %v1308_v9 }
 0x2da   :  { %1759 = vmatpush3.msra.mxu1 %v1311_v10  ;;  %1756 = vmatmul.mubr.msk.f32.vlgmr.msra.gmra.mxu0 %vm456_vm2, %v2143_v29  ;;  %v2238_v9 = vand.u32 7, %v443_v2 }
 0x2db   :  { %v2213_v13 = vmax.f32 %v895_v8, %v896_v11  ;;  %1761 = vmatmul.mubr.msk.f32.vlgmr.msra.gmra.mxu1 %vm456_vm2, %v2153_v30 }
 0x2dd   :  { %vm898_vm3 = vcmp.eq.f32.partialorder %v890_v54, %v2213_v13  ;;  %v910_v63 = vsub.f32 %v2213_v13, %v2213_v13 }
 0x2de   :  { %v899_v14 = vsel %vm898_vm3, %v2209_v12, 8 }
 0x2df   :  { %v900_v15 = vsel %vm172_vm0, %v899_v14, 2147483647  ;;  %v911_v6 = vmul.f32 1.442695, %v910_v63 }
 0x2e0   :  { %v901_v16 = vrot.slane %v900_v15, 4 }
 0x2e2   :  { %vm902_vm4 = vcmp.lt.s32.totalorder %v900_v15, %v901_v16 }
 0x2e3   :  { %v903_v17 = vsel %vm902_vm4, %v900_v15, %v901_v16 }
 0x2e4   :  { %v904_v18 = vrot.slane %v903_v17, 2 }
 0x2e6   :  { %vm905_vm5 = vcmp.lt.s32.totalorder %v903_v17, %v904_v18 }
 0x2e7   :  { %v906_v19 = vsel %vm905_vm5, %v903_v17, %v904_v18 }
 0x2e8   :  { %v907_v20 = vrot.slane %v906_v19, 1 }
 0x2ea   :  { %vm908_vm6 = vcmp.lt.s32.totalorder %v906_v19, %v907_v20 }
 0x2eb   :  { %v2220_v21 = vsel %vm908_vm6, %v906_v19, %v907_v20 }
 0x2ec   :  { %vm920_vm7 = vcmp.eq.s32.totalorder %v2209_v12, %v2220_v21  ;;  %v914_v16 = vadd.s32 %v2220_v21, %v2238_v9 }
 0x2ed   :  { %v921_v22 = vsel %vm920_vm7, -inf, %v890_v54 }
 0x2ee   :  { %v922_v23 = vsel %vm172_vm0, %v921_v22, -inf  ;;  %vm915_vm6 = vcmp.lt.s32.totalorder %v914_v16, 7 }
 0x2ef   :  { %v923_v24 = vrot.slane %v922_v23, 4 }
 0x2f1   :  { %v924_v25 = vmax.f32 %v922_v23, %v923_v24 }
 0x2f3   :  { %v925_v26 = vrot.slane %v924_v25, 2 }
 0x2f5   :  { %v926_v27 = vmax.f32 %v924_v25, %v925_v26 }
 0x2f7   :  { %v927_v28 = vrot.slane %v926_v27, 1 }
 0x2f9   :  { %v928_v29 = vmax.f32 %v926_v27, %v927_v28 }
 0x2fb   :  { %vm929_vm8 = vcmp.eq.f32.partialorder %v921_v22, %v928_v29  ;;  %v941_v61 = vsub.f32 %v928_v29, %v2213_v13 }
 0x2fc   :  { %v930_v30 = vsel %vm929_vm8, %v2209_v12, 8 }
 0x2fd   :  { %v931_v32 = vsel %vm172_vm0, %v930_v30, 2147483647  ;;  %v942_v3 = vmul.f32 1.442695, %v941_v61 }
 0x2fe   :  { %v932_v35 = vrot.slane %v931_v32, 4 }
 0x2ff   :  { %1777 = vpow2.f32 %v942_v3 }
 0x300   :  { %vm933_vm9 = vcmp.lt.s32.totalorder %v931_v32, %v932_v35  ;;  %1779 = vpow2.f32 %v911_v6 }
 0x301   :  { %v934_v36 = vsel %vm933_vm9, %v931_v32, %v932_v35 }
 0x302   :  { %v935_v37 = vrot.slane %v934_v36, 2 }
 0x304   :  { %vm936_vm10 = vcmp.lt.s32.totalorder %v934_v36, %v935_v37 }
 0x305   :  { %v937_v38 = vsel %vm936_vm10, %v934_v36, %v935_v37 }
 0x306   :  { %v938_v39 = vrot.slane %v937_v38, 1 }
 0x308   :  { %vm939_vm11 = vcmp.lt.s32.totalorder %v937_v38, %v938_v39 }
 0x309   :  { %v940_v40 = vsel %vm939_vm11, %v937_v38, %v938_v39 }
 0x30a   :  { %vm951_vm12 = vcmp.eq.s32.totalorder %v2209_v12, %v940_v40  ;;  %v945_v11 = vadd.s32 %v940_v40, %v2238_v9 }
 0x30b   :  { %v952_v41 = vsel %vm951_vm12, -inf, %v921_v22  ;;  %v916_v22 = vsel %vm915_vm6, %v914_v16, 7 }
 0x30c   :  { %v953_v42 = vsel %vm172_vm0, %v952_v41, -inf  ;;  %vm946_vm4 = vcmp.lt.s32.totalorder %v945_v11, 7  ;;  %v1778_v26 = vpop.eup %1777  ;;  %vm917_vm10 = vcmp.eq.s32.totalorder %v2209_v12, %v916_v22 }
 0x30d   :  { %v954_v43 = vrot.slane %v953_v42, 4  ;;  %v947_v20 = vsel %vm946_vm4, %v945_v11, 7  ;;  %v1780_v21 = vpop.eup %1779 }
 0x30e   :  { %vm948_vm9 = vcmp.eq.s32.totalorder %v2209_v12, %v947_v20  ;;  %v918_v32 = vsel %vm917_vm10, %v1780_v21, 0.0  ;;  %v944_v35 = vadd.f32 %v1780_v21, %v1778_v26 }
 0x30f   :  { %v955_v44 = vmax.f32 %v953_v42, %v954_v43  ;;  %v949_v27 = vsel %vm948_vm9, %v1778_v26, 0.0 }
 0x310   :  { %v950_v38 = vadd.f32 %v949_v27, %v918_v32 }
 0x311   :  { %v956_v45 = vrot.slane %v955_v44, 2 }
 0x313   :  { %v957_v46 = vmax.f32 %v955_v44, %v956_v45  ;;  %v430_v44 = vadd.f32 %v2170_v31, %v2175_v34 }
 0x315   :  { %v958_v47 = vrot.slane %v957_v46, 1 }
 0x317   :  { %v959_v48 = vmax.f32 %v957_v46, %v958_v47 }
 0x319   :  { %vm960_vm13 = vcmp.eq.f32.partialorder %v952_v41, %v959_v48  ;;  %v972_v0 = vsub.f32 %v959_v48, %v2213_v13 }
 0x31a   :  { %v961_v49 = vsel %vm960_vm13, %v2209_v12, 8 }
 0x31b   :  { %v962_v50 = vsel %vm172_vm0, %v961_v49, 2147483647  ;;  %v973_v7 = vmul.f32 1.442695, %v972_v0 }
 0x31c   :  { %v963_v51 = vrot.slane %v962_v50, 4 }
 0x31d   :  { %1781 = vpow2.f32 %v973_v7 }
 0x31e   :  { %vm964_vm14 = vcmp.lt.s32.totalorder %v962_v50, %v963_v51 }
 0x31f   :  { %v965_v52 = vsel %vm964_vm14, %v962_v50, %v963_v51 }
 0x320   :  { %v966_v53 = vrot.slane %v965_v52, 2 }
 0x322   :  { %vm967_vm15 = vcmp.lt.s32.totalorder %v965_v52, %v966_v53 }
 0x323   :  { %v968_v54 = vsel %vm967_vm15, %v965_v52, %v966_v53  ;;  %vm1024_vm15 = vcmask 253952  }
 0x324   :  { %v969_v55 = vrot.slane %v968_v54, 1 }
 0x326   :  { %vm970_vm1 = vcmp.lt.s32.totalorder %v968_v54, %v969_v55 }
 0x327   :  { %v971_v56 = vsel %vm970_vm1, %v968_v54, %v969_v55 }
 0x328   :  { %vm982_vm2 = vcmp.eq.s32.totalorder %v2209_v12, %v971_v56  ;;  %v976_v17 = vadd.s32 %v971_v56, %v2238_v9 }
 0x329   :  { %v983_v57 = vsel %vm982_vm2, -inf, %v952_v41 }
 0x32a   :  { %v984_v58 = vsel %vm172_vm0, %v983_v57, -inf  ;;  %vm977_vm7 = vcmp.lt.s32.totalorder %v976_v17, 7  ;;  %v1782_v29 = vpop.eup %1781 }
 0x32b   :  { %v985_v59 = vrot.slane %v984_v58, 4  ;;  %v978_v23 = vsel %vm977_vm7, %v976_v17, 7  ;;  %v975_v40 = vadd.f32 %v1782_v29, %v944_v35 }
 0x32c   :  { %vm979_vm11 = vcmp.eq.s32.totalorder %v2209_v12, %v978_v23 }
 0x32d   :  { %v986_v60 = vmax.f32 %v984_v58, %v985_v59  ;;  %v980_v36 = vsel %vm979_vm11, %v1782_v29, 0.0 }
 0x32e   :  { %v981_v41 = vadd.f32 %v980_v36, %v950_v38 }
 0x32f   :  { %v987_v62 = vrot.slane %v986_v60, 2 }
 0x331   :  { %v988_v1 = vmax.f32 %v986_v60, %v987_v62 }
 0x333   :  { %v989_v5 = vrot.slane %v988_v1, 1 }
 0x335   :  { %v990_v8 = vmax.f32 %v988_v1, %v989_v5 }
 0x337   :  { %vm991_vm3 = vcmp.eq.f32.partialorder %v983_v57, %v990_v8  ;;  %v1003_v10 = vsub.f32 %v990_v8, %v2213_v13 }
 0x338   :  { %v992_v14 = vsel %vm991_vm3, %v2209_v12, 8 }
 0x339   :  { %v993_v15 = vsel %vm172_vm0, %v992_v14, 2147483647  ;;  %v1004_v4 = vmul.f32 1.442695, %v1003_v10 }
 0x33a   :  { %v994_v18 = vrot.slane %v993_v15, 4 }
 0x33b   :  { %1783 = vpow2.f32 %v1004_v4 }
 0x33c   :  { %vm995_vm5 = vcmp.lt.s32.totalorder %v993_v15, %v994_v18 }
 0x33d   :  { %v996_v19 = vsel %vm995_vm5, %v993_v15, %v994_v18 }
 0x33e   :  { %v997_v13 = vrot.slane %v996_v19, 2 }
 0x340   :  { %vm998_vm8 = vcmp.lt.s32.totalorder %v996_v19, %v997_v13 }
 0x341   :  { %v999_v24 = vsel %vm998_vm8, %v996_v19, %v997_v13 }
 0x342   :  { %v1000_v25 = vrot.slane %v999_v24, 1 }
 0x344   :  { %vm1001_vm12 = vcmp.lt.s32.totalorder %v999_v24, %v1000_v25 }
 0x345   :  { %v1002_v28 = vsel %vm1001_vm12, %v999_v24, %v1000_v25 }
 0x346   :  { %v1007_v30 = vadd.s32 %v1002_v28, %v2238_v9 }
 0x348   :  { %v1784_v37 = vpop.eup %1783  ;;  %vm1008_vm13 = vcmp.lt.s32.totalorder %v1007_v30, 7 }
 0x349   :  { %v1009_v39 = vsel %vm1008_vm13, %v1007_v30, 7  ;;  %v1006_v43 = vadd.f32 %v1784_v37, %v975_v40 }
 0x34a   :  { %vm1010_vm14 = vcmp.eq.s32.totalorder %v2209_v12, %v1009_v39 }
 0x34b   :  { %v1011_v42 = vsel %vm1010_vm14, %v1784_v37, 0.0  ;;  %1785 = vrcp.f32 %v1006_v43 }
 0x34c   :  { %v1012_v45 = vadd.f32 %v1011_v42, %v981_v41 }
 0x34e   :  { %v1013_v46 = vmul.f32 %v1012_v45, %v430_v44 }
 0x350   :  { %v1014_v47 = vsel %vm172_vm0, %v1013_v46, 0.0 }
 0x351   :  { %v1015_v48 = vrot.slane %v1014_v47, 4 }
 0x353   :  { %v1016_v49 = vadd.f32 %v1015_v48, %v1014_v47 }
 0x355   :  { %v1017_v50 = vrot.slane %v1016_v49, 2 }
 0x357   :  { %v1018_v51 = vadd.f32 %v1017_v50, %v1016_v49 }
 0x358   :  { %v1786_v54 = vpop.eup %1785 }
 0x359   :  { %v1019_v52 = vrot.slane %v1018_v51, 1 }
 0x35b   :  { %v1020_v53 = vadd.f32 %v1019_v52, %v1018_v51 }
 0x35d   :  { %v1022_v55 = vmul.f32 %v1786_v54, %v1020_v53 }
 0x35f   :  { %v1023_v56 = vmul.f32 8.0, %v1022_v55 }
 0x361   :  { %1025 = vst.msk [vmem:[#allocation17] sm:$0x1] %vm1024_vm15, %v1023_v56 }
 0x39a   :  { %v1378_v57 = vpop.f32.mrf.mxu0 }
 0x39b   :  { %v1448_v58 = vpop.f32.mrf.mxu1 }
 0x39c   :  { %v1452_v31 = vsub.f32 %v1378_v57, %v1448_v58  ;;  %v1757_v34 = vpop.f32.mrf.mxu0 }
 0x39d   :  { %v1762_v59 = vpop.f32.mrf.mxu1 }
 0x39e   :  { %v1453_v60 = vmul.f32 0.125, %v1452_v31 }
 0x3a0   :  { %v1454_v61 = vsel %vm172_vm0, %v1453_v60, -inf }
 0x3a1   :  { %v1455_v62 = vrot.slane %v1454_v61, 4 }
 0x3a3   :  { %v1456_v63 = vmax.f32 %v1454_v61, %v1455_v62 }
 0x3a5   :  { %v1457_v0 = vrot.slane %v1456_v63, 2 }
 0x3a7   :  { %v1458_v1 = vmax.f32 %v1456_v63, %v1457_v0 }
 0x3a9   :  { %v1459_v2 = vrot.slane %v1458_v1, 1 }
 0x3ab   :  { %v2257_v3 = vmax.f32 %v1458_v1, %v1459_v2 }
 0x3ad   :  { %vm1461_vm1 = vcmp.eq.f32.partialorder %v1453_v60, %v2257_v3  ;;  %v1473_v55 = vsub.f32 %v2257_v3, %v2257_v3 }
 0x3ae   :  { %v1462_v5 = vsel %vm1461_vm1, %v2209_v12, 8 }
 0x3af   :  { %v1463_v6 = vsel %vm172_vm0, %v1462_v5, 2147483647  ;;  %v1474_v34 = vmul.f32 1.442695, %v1473_v55 }
 0x3b0   :  { %v1464_v7 = vrot.slane %v1463_v6, 4 }
 0x3b2   :  { %vm1465_vm2 = vcmp.lt.s32.totalorder %v1463_v6, %v1464_v7 }
 0x3b3   :  { %v1466_v8 = vsel %vm1465_vm2, %v1463_v6, %v1464_v7 }
 0x3b4   :  { %v1467_v10 = vrot.slane %v1466_v8, 2 }
 0x3b6   :  { %vm1468_vm3 = vcmp.lt.s32.totalorder %v1466_v8, %v1467_v10 }
 0x3b7   :  { %v1469_v11 = vsel %vm1468_vm3, %v1466_v8, %v1467_v10 }
 0x3b8   :  { %v1470_v14 = vrot.slane %v1469_v11, 1 }
 0x3ba   :  { %vm1471_vm4 = vcmp.lt.s32.totalorder %v1469_v11, %v1470_v14 }
 0x3bb   :  { %v2262_v15 = vsel %vm1471_vm4, %v1469_v11, %v1470_v14 }
 0x3bc   :  { %vm1483_vm5 = vcmp.eq.s32.totalorder %v2209_v12, %v2262_v15  ;;  %v1477_v2 = vadd.s32 %v2262_v15, %v2238_v9 }
 0x3bd   :  { %v1484_v4 = vsel %vm1483_vm5, -inf, %v1453_v60 }
 0x3be   :  { %v1485_v16 = vsel %vm172_vm0, %v1484_v4, -inf  ;;  %vm1478_vm5 = vcmp.lt.s32.totalorder %v1477_v2, 7 }
 0x3bf   :  { %v1486_v17 = vrot.slane %v1485_v16, 4  ;;  %v1479_v10 = vsel %vm1478_vm5, %v1477_v2, 7 }
 0x3c1   :  { %v1487_v18 = vmax.f32 %v1485_v16, %v1486_v17 }
 0x3c3   :  { %v1488_v19 = vrot.slane %v1487_v18, 2 }
 0x3c5   :  { %v1489_v13 = vmax.f32 %v1487_v18, %v1488_v19 }
 0x3c7   :  { %v1490_v20 = vrot.slane %v1489_v13, 1 }
 0x3c9   :  { %v1491_v22 = vmax.f32 %v1489_v13, %v1490_v20 }
 0x3cb   :  { %vm1492_vm6 = vcmp.eq.f32.partialorder %v1484_v4, %v1491_v22  ;;  %v1504_v53 = vsub.f32 %v1491_v22, %v2257_v3 }
 0x3cc   :  { %v1493_v23 = vsel %vm1492_vm6, %v2209_v12, 8 }
 0x3cd   :  { %v1494_v24 = vsel %vm172_vm0, %v1493_v23, 2147483647  ;;  %v1505_v58 = vmul.f32 1.442695, %v1504_v53 }
 0x3ce   :  { %v1495_v25 = vrot.slane %v1494_v24, 4 }
 0x3cf   :  { %1787 = vpow2.f32 %v1505_v58 }
 0x3d0   :  { %vm1496_vm7 = vcmp.lt.s32.totalorder %v1494_v24, %v1495_v25  ;;  %1789 = vpow2.f32 %v1474_v34 }
 0x3d1   :  { %v1497_v26 = vsel %vm1496_vm7, %v1494_v24, %v1495_v25 }
 0x3d2   :  { %v1498_v21 = vrot.slane %v1497_v26, 2 }
 0x3d4   :  { %vm1499_vm8 = vcmp.lt.s32.totalorder %v1497_v26, %v1498_v21 }
 0x3d5   :  { %v1500_v27 = vsel %vm1499_vm8, %v1497_v26, %v1498_v21 }
 0x3d6   :  { %v1501_v28 = vrot.slane %v1500_v27, 1 }
 0x3d8   :  { %vm1502_vm9 = vcmp.lt.s32.totalorder %v1500_v27, %v1501_v28 }
 0x3d9   :  { %v1503_v29 = vsel %vm1502_vm9, %v1500_v27, %v1501_v28  ;;  %vm1480_vm9 = vcmp.eq.s32.totalorder %v2209_v12, %v1479_v10 }
 0x3da   :  { %vm1514_vm10 = vcmp.eq.s32.totalorder %v2209_v12, %v1503_v29  ;;  %v1508_v62 = vadd.s32 %v1503_v29, %v2238_v9 }
 0x3db   :  { %v1515_v30 = vsel %vm1514_vm10, -inf, %v1484_v4 }
 0x3dc   :  { %v1516_v32 = vsel %vm172_vm0, %v1515_v30, -inf  ;;  %vm1509_vm3 = vcmp.lt.s32.totalorder %v1508_v62, 7  ;;  %v1788_v16 = vpop.eup %1787 }
 0x3dd   :  { %v1517_v35 = vrot.slane %v1516_v32, 4  ;;  %v1510_v8 = vsel %vm1509_vm3, %v1508_v62, 7  ;;  %v1790_v15 = vpop.eup %1789 }
 0x3de   :  { %vm1511_vm8 = vcmp.eq.s32.totalorder %v2209_v12, %v1510_v8  ;;  %v1481_v20 = vsel %vm1480_vm9, %v1790_v15, 0.0  ;;  %v1507_v22 = vadd.f32 %v1790_v15, %v1788_v16 }
 0x3df   :  { %v1518_v36 = vmax.f32 %v1516_v32, %v1517_v35  ;;  %v1512_v17 = vsel %vm1511_vm8, %v1788_v16, 0.0 }
 0x3e0   :  { %v1513_v25 = vadd.f32 %v1512_v17, %v1481_v20 }
 0x3e1   :  { %v1519_v37 = vrot.slane %v1518_v36, 2 }
 0x3e3   :  { %v1520_v38 = vmax.f32 %v1518_v36, %v1519_v37 }
 0x3e5   :  { %v1521_v39 = vrot.slane %v1520_v38, 1 }
 0x3e7   :  { %v1522_v40 = vmax.f32 %v1520_v38, %v1521_v39 }
 0x3e9   :  { %vm1523_vm11 = vcmp.eq.f32.partialorder %v1515_v30, %v1522_v40  ;;  %v1535_v56 = vsub.f32 %v1522_v40, %v2257_v3 }
 0x3ea   :  { %v1524_v41 = vsel %vm1523_vm11, %v2209_v12, 8 }
 0x3eb   :  { %v1525_v42 = vsel %vm172_vm0, %v1524_v41, 2147483647  ;;  %v1536_v59 = vmul.f32 1.442695, %v1535_v56 }
 0x3ec   :  { %v1526_v43 = vrot.slane %v1525_v42, 4 }
 0x3ed   :  { %1791 = vpow2.f32 %v1536_v59 }
 0x3ee   :  { %vm1527_vm12 = vcmp.lt.s32.totalorder %v1525_v42, %v1526_v43 }
 0x3ef   :  { %v1528_v44 = vsel %vm1527_vm12, %v1525_v42, %v1526_v43 }
 0x3f0   :  { %v1529_v45 = vrot.slane %v1528_v44, 2 }
 0x3f2   :  { %vm1530_vm13 = vcmp.lt.s32.totalorder %v1528_v44, %v1529_v45 }
 0x3f3   :  { %v1531_v46 = vsel %vm1530_vm13, %v1528_v44, %v1529_v45 }
 0x3f4   :  { %v1532_v47 = vrot.slane %v1531_v46, 1 }
 0x3f6   :  { %vm1533_vm14 = vcmp.lt.s32.totalorder %v1531_v46, %v1532_v47 }
 0x3f7   :  { %v1534_v48 = vsel %vm1533_vm14, %v1531_v46, %v1532_v47 }
 0x3f8   :  { %vm1545_vm1 = vcmp.eq.s32.totalorder %v2209_v12, %v1534_v48  ;;  %v1539_v5 = vadd.s32 %v1534_v48, %v2238_v9 }
 0x3f9   :  { %v1546_v49 = vsel %vm1545_vm1, -inf, %v1515_v30 }
 0x3fa   :  { %v1547_v50 = vsel %vm172_vm0, %v1546_v49, -inf  ;;  %vm1540_vm6 = vcmp.lt.s32.totalorder %v1539_v5, 7  ;;  %v1792_v19 = vpop.eup %1791 }
 0x3fb   :  { %v1548_v51 = vrot.slane %v1547_v50, 4  ;;  %v1541_v11 = vsel %vm1540_vm6, %v1539_v5, 7  ;;  %v1538_v21 = vadd.f32 %v1792_v19, %v1507_v22 }
 0x3fc   :  { %vm1542_vm10 = vcmp.eq.s32.totalorder %v2209_v12, %v1541_v11 }
 0x3fd   :  { %v1549_v52 = vmax.f32 %v1547_v50, %v1548_v51  ;;  %v1543_v23 = vsel %vm1542_vm10, %v1792_v19, 0.0 }
 0x3fe   :  { %v1544_v27 = vadd.f32 %v1543_v23, %v1513_v25 }
 0x3ff   :  { %v1550_v54 = vrot.slane %v1549_v52, 2 }
 0x401   :  { %v1551_v57 = vmax.f32 %v1549_v52, %v1550_v54 }
 0x403   :  { %v1552_v31 = vrot.slane %v1551_v57, 1 }
 0x405   :  { %v1553_v60 = vmax.f32 %v1551_v57, %v1552_v31 }
 0x407   :  { %vm1554_vm2 = vcmp.eq.f32.partialorder %v1546_v49, %v1553_v60  ;;  %v1566_v61 = vsub.f32 %v1553_v60, %v2257_v3 }
 0x408   :  { %v1555_v63 = vsel %vm1554_vm2, %v2209_v12, 8 }
 0x409   :  { %v1556_v0 = vsel %vm172_vm0, %v1555_v63, 2147483647  ;;  %v1567_v1 = vmul.f32 1.442695, %v1566_v61 }
 0x40a   :  { %v1557_v6 = vrot.slane %v1556_v0, 4 }
 0x40b   :  { %1793 = vpow2.f32 %v1567_v1 }
 0x40c   :  { %vm1558_vm4 = vcmp.lt.s32.totalorder %v1556_v0, %v1557_v6 }
 0x40d   :  { %v1559_v7 = vsel %vm1558_vm4, %v1556_v0, %v1557_v6 }
 0x40e   :  { %v1560_v3 = vrot.slane %v1559_v7, 2 }
 0x410   :  { %vm1561_vm7 = vcmp.lt.s32.totalorder %v1559_v7, %v1560_v3 }
 0x411   :  { %v1562_v14 = vsel %vm1561_vm7, %v1559_v7, %v1560_v3 }
 0x412   :  { %v1563_v4 = vrot.slane %v1562_v14, 1 }
 0x414   :  { %vm1564_vm11 = vcmp.lt.s32.totalorder %v1562_v14, %v1563_v4 }
 0x415   :  { %v1565_v18 = vsel %vm1564_vm11, %v1562_v14, %v1563_v4 }
 0x416   :  { %v1570_v13 = vadd.s32 %v1565_v18, %v2238_v9 }
 0x418   :  { %v1794_v24 = vpop.eup %1793  ;;  %vm1571_vm12 = vcmp.lt.s32.totalorder %v1570_v13, 7 }
 0x419   :  { %v1572_v26 = vsel %vm1571_vm12, %v1570_v13, 7  ;;  %v1569_v29 = vadd.f32 %v1794_v24, %v1538_v21 }
 0x41a   :  { %vm1573_vm13 = vcmp.eq.s32.totalorder %v2209_v12, %v1572_v26 }
 0x41b   :  { %v1574_v28 = vsel %vm1573_vm13, %v1794_v24, 0.0  ;;  %1795 = vrcp.f32 %v1569_v29 }
 0x41c   :  { %v1575_v30 = vadd.f32 %v1574_v28, %v1544_v27 }
 0x41e   :  { %v1576_v32 = vmul.f32 %v1575_v30, %v2173_v33 }
 0x420   :  { %v1577_v35 = vsel %vm172_vm0, %v1576_v32, 0.0 }
 0x421   :  { %v1578_v9 = vrot.slane %v1577_v35, 4 }
 0x423   :  { %v1579_v36 = vadd.f32 %v1578_v9, %v1577_v35 }
 0x425   :  { %v1580_v37 = vrot.slane %v1579_v36, 2 }
 0x427   :  { %v1581_v38 = vadd.f32 %v1580_v37, %v1579_v36 }
 0x428   :  { %v1796_v41 = vpop.eup %1795 }
 0x429   :  { %v1582_v39 = vrot.slane %v1581_v38, 1 }
 0x42b   :  { %v1583_v40 = vadd.f32 %v1582_v39, %v1581_v38 }
 0x42d   :  { %v1585_v42 = vmul.f32 %v1796_v41, %v1583_v40 }
 0x42f   :  { %v1586_v43 = vmul.f32 8.0, %v1585_v42 }
 0x431   :  { %1587 = vst.msk [vmem:[#allocation17 + $0x1] sm:$0x1] %vm1024_vm15, %v1586_v43 }
 0x432   :  { %1988 = shalt.err (!%p1985_p7)
}
 0x433   :  { %1597 = dma.vmem_to_hbm [thread:$0]  %s1595_s10, 32, %s2308_s11, [#allocation4]  }
 0x434   :  { %2007 = dma.done.wait [#allocation4], 32  }
 0x435   :  { %2008 = vsyncadd [#allocation4], 4294967264 }
 0x436   :  { %1601 = vsyncpa [#allocation3], 1 }
 0x437   :  { %1602 = vsyncpa [#allocation6], 1 }
 0x438   :  { %1603 = vsyncpa [#allocation9], 1 }
 0x439   :  { %1604 = vsyncpa [#allocation12], 1 }
 0x43a   :  { %1605 = vsyncpa [#allocation15], 1 }
 0x43b   :  { %1606 = vsyncpa [#allocation4], 1 }

</bundles_post_ra>
